<compile_context>
chip_gen: v6e
topology: v6e:2x2x1
jax: 0.10.0
libtpu: 0.0.40
codegen_flags: <defaults>
</compile_context>

<pallas_src>
import jax
import jax.numpy as jnp
from jax.experimental import pallas as pl
from jax.experimental.pallas import tpu as pltpu

C1 = 0.01 ** 2
C2 = 0.03 ** 2


def ssim_kernel(x_ref, y_ref, out_ref, xpad_ref, ypad_ref, vpad_ref):
    # x_ref, y_ref : (B, H, W) raw image blocks
    # out_ref      : (B, H, W) SSIM loss map
    # xpad_ref/ypad_ref : (B, H, W+2) scratch, reflect-padded along W
    # vpad_ref          : (B, H+2, W) scratch, reflect-padded along H (reused)
    B, H, W = out_ref.shape

    # ---- fused ReflectionPad2d(1) along W (lane axis), built in VMEM ----
    def pad_w(src_ref, buf):
        a = src_ref[...].astype(jnp.float32)
        buf[:, :, 1:W + 1] = a
        buf[:, :, 0:1] = a[:, :, 1:2]                   # col -1 -> col 1
        buf[:, :, W + 1:W + 2] = a[:, :, W - 2:W - 1]   # col W  -> col W-2

    pad_w(x_ref, xpad_ref)
    pad_w(y_ref, ypad_ref)

    # Three lane shifts of each padded input, shared by all five pooled sums.
    x0 = xpad_ref[:, :, 0:W]
    x1 = xpad_ref[:, :, 1:W + 1]
    x2 = xpad_ref[:, :, 2:W + 2]
    y0 = ypad_ref[:, :, 0:W]
    y1 = ypad_ref[:, :, 1:W + 1]
    y2 = ypad_ref[:, :, 2:W + 2]

    # Horizontal 3-tap sums (separable pool, first pass).
    hx = x0 + x1 + x2
    hy = y0 + y1 + y2
    hxx = x0 * x0 + x1 * x1 + x2 * x2
    hyy = y0 * y0 + y1 * y1 + y2 * y2
    hxy = x0 * y0 + x1 * y1 + x2 * y2

    # Vertical 3-tap sum with fused reflection pad along H (sublane axis).
    def vsum3(h2):
        vpad_ref[:, 1:H + 1, :] = h2
        vpad_ref[:, 0:1, :] = h2[:, 1:2, :]                  # row -1 -> row 1
        vpad_ref[:, H + 1:H + 2, :] = h2[:, H - 2:H - 1, :]  # row H  -> row H-2
        return (vpad_ref[:, 0:H, :]
                + vpad_ref[:, 1:H + 1, :]
                + vpad_ref[:, 2:H + 2, :])

    inv9 = jnp.float32(1.0 / 9.0)
    mu_x = vsum3(hx) * inv9
    mu_y = vsum3(hy) * inv9
    e_xx = vsum3(hxx) * inv9
    e_yy = vsum3(hyy) * inv9
    e_xy = vsum3(hxy) * inv9

    sigma_x = e_xx - mu_x * mu_x
    sigma_y = e_yy - mu_y * mu_y
    sigma_xy = e_xy - mu_x * mu_y

    ssim_n = (2.0 * mu_x * mu_y + C1) * (2.0 * sigma_xy + C2)
    ssim_d = (mu_x * mu_x + mu_y * mu_y + C1) * (sigma_x + sigma_y + C2)

    # Exact reciprocal (EUP slot) instead of a VALU divide.
    loss = (1.0 - ssim_n * pl.reciprocal(ssim_d, approx=False)) * 0.5
    out_ref[...] = jnp.clip(loss, 0.0, 1.0).astype(out_ref.dtype)


def _pick_block(nc, h, w, max_block_bytes=1 << 20):
    """Largest divisor of nc that keeps a block <= ~1 MiB and >=2 grid steps."""
    per_img = h * w * 4
    best = 1
    for b in range(1, nc + 1):
        if nc % b:
            continue
        if b * per_img > max_block_bytes:
            continue
        if nc // b < 2 and nc > 1:
            continue  # keep >=2 parallel steps so both v7x TensorCores get work
        best = b
    return best


def ssim_pallas(x, y):
    """x, y: (N, C, H, W) float32. Returns (N, C, H, W) SSIM loss map."""
    N, C, H, W = x.shape
    nc = N * C
    xf = x.reshape(nc, H, W)   # free reshape, no HBM pass
    yf = y.reshape(nc, H, W)

    b_blk = _pick_block(nc, H, W)
    grid = (nc // b_blk,)

    # For very large H (e.g. 192x640 Monodepth frames) one would tile H with a
    # 2-row halo per block instead of whole-image blocks to bound VMEM (esp.
    # on v7x's 64 MiB budget); whole images are fine at these sizes.
    out = pl.pallas_call(
        ssim_kernel,
        out_shape=jax.ShapeDtypeStruct((nc, H, W), x.dtype),
        grid=grid,
        in_specs=[
            pl.BlockSpec((b_blk, H, W), lambda i: (i, 0, 0)),
            pl.BlockSpec((b_blk, H, W), lambda i: (i, 0, 0)),
        ],
        out_specs=pl.BlockSpec((b_blk, H, W), lambda i: (i, 0, 0)),
        scratch_shapes=[
            pltpu.VMEM((b_blk, H, W + 2), jnp.float32),  # x, W-padded
            pltpu.VMEM((b_blk, H, W + 2), jnp.float32),  # y, W-padded
            pltpu.VMEM((b_blk, H + 2, W), jnp.float32),  # shared H-padded buf
        ],
        compiler_params=pltpu.CompilerParams(
            dimension_semantics=("parallel",),
            vmem_limit_bytes=48 * 1024 * 1024,
        ),
    )(xf, yf)
    return out.reshape(N, C, H, W)


def ssim_reference(x, y):
    """Pure-JAX reference mirroring the PyTorch module (for correctness check)."""
    pad = ((0, 0), (0, 0), (1, 1), (1, 1))
    xp = jnp.pad(x, pad, mode="reflect")
    yp = jnp.pad(y, pad, mode="reflect")

    def avg_pool3(a):
        return jax.lax.reduce_window(
            a, 0.0, jax.lax.add,
            window_dimensions=(1, 1, 3, 3),
            window_strides=(1, 1, 1, 1),
            padding="VALID",
        ) / 9.0

    mu_x = avg_pool3(xp)
    mu_y = avg_pool3(yp)
    sigma_x = avg_pool3(xp * xp) - mu_x ** 2
    sigma_y = avg_pool3(yp * yp) - mu_y ** 2
    sigma_xy = avg_pool3(xp * yp) - mu_x * mu_y
    ssim_n = (2 * mu_x * mu_y + C1) * (2 * sigma_xy + C2)
    ssim_d = (mu_x ** 2 + mu_y ** 2 + C1) * (sigma_x + sigma_y + C2)
    return jnp.clip((1 - ssim_n / ssim_d) / 2, 0.0, 1.0)


if __name__ == "__main__":
    key = jax.random.PRNGKey(0)
    kx, ky = jax.random.split(key)
    N, C, H, W = 2, 4, 16, 16
    x = jax.random.uniform(kx, (N, C, H, W), dtype=jnp.float32)
    y = jax.random.uniform(ky, (N, C, H, W), dtype=jnp.float32)

    out = ssim_pallas(x, y)
    jax.block_until_ready(out)

    ref = ssim_reference(x, y)
    assert out.shape == (N, C, H, W)
    assert jnp.allclose(out, ref, atol=1e-5, rtol=1e-5), "mismatch vs reference"

    print("KERNEL_OK")
</pallas_src>

<mosaic_0001>
module attributes {stable_mosaic.version = 11 : i64} {
  func.func @ssim_kernel(%arg0: i32, %arg1: memref<4x16x16xf32, #tpu.memory_space<vmem>>, %arg2: memref<4x16x16xf32, #tpu.memory_space<vmem>>, %arg3: memref<4x16x16xf32, #tpu.memory_space<vmem>>, %arg4: memref<4x16x18xf32, #tpu.memory_space<vmem>>, %arg5: memref<4x16x18xf32, #tpu.memory_space<vmem>>, %arg6: memref<4x18x16xf32, #tpu.memory_space<vmem>>) attributes {dimension_semantics = [#tpu.dimension_semantics<parallel>], iteration_bounds = array<i64: 2>, scalar_prefetch = 0 : i64, scratch_operands = 3 : i64, tpu.core_type = #tpu.core_type<tc>, window_params = [{transform_indices = @transform_0, window_bounds = array<i64: 4, 16, 16>}, {transform_indices = @transform_1, window_bounds = array<i64: 4, 16, 16>}, {transform_indices = @transform_2, window_bounds = array<i64: 4, 16, 16>}]} {
    %c0 = arith.constant 0 : index
    %c0_0 = arith.constant 0 : index
    %c0_1 = arith.constant 0 : index
    %0 = vector.load %arg1[%c0, %c0_0, %c0_1] : memref<4x16x16xf32, #tpu.memory_space<vmem>>, vector<4x16x16xf32>
    %c0_2 = arith.constant 0 : index
    %c0_3 = arith.constant 0 : index
    %c1 = arith.constant 1 : index
    %1 = vector.load %arg4[%c0_2, %c0_3, %c1] : memref<4x16x18xf32, #tpu.memory_space<vmem>>, vector<4x16x16xf32>
    tpu.vector_store %arg4[%c0_2, %c0_3, %c1], %0 {strides = array<i32>} : memref<4x16x18xf32, #tpu.memory_space<vmem>>, vector<4x16x16xf32>,
    %2 = vector.extract_strided_slice %0 {offsets = [0, 0, 1], sizes = [4, 16, 1], strides = [1, 1, 1]} : vector<4x16x16xf32> to vector<4x16x1xf32>
    %c0_4 = arith.constant 0 : index
    %c0_5 = arith.constant 0 : index
    %c0_6 = arith.constant 0 : index
    %3 = vector.load %arg4[%c0_4, %c0_5, %c0_6] : memref<4x16x18xf32, #tpu.memory_space<vmem>>, vector<4x16x1xf32>
    tpu.vector_store %arg4[%c0_4, %c0_5, %c0_6], %2 {strides = array<i32>} : memref<4x16x18xf32, #tpu.memory_space<vmem>>, vector<4x16x1xf32>,
    %4 = vector.extract_strided_slice %0 {offsets = [0, 0, 14], sizes = [4, 16, 1], strides = [1, 1, 1]} : vector<4x16x16xf32> to vector<4x16x1xf32>
    %c0_7 = arith.constant 0 : index
    %c0_8 = arith.constant 0 : index
    %c17 = arith.constant 17 : index
    %5 = vector.load %arg4[%c0_7, %c0_8, %c17] : memref<4x16x18xf32, #tpu.memory_space<vmem>>, vector<4x16x1xf32>
    tpu.vector_store %arg4[%c0_7, %c0_8, %c17], %4 {strides = array<i32>} : memref<4x16x18xf32, #tpu.memory_space<vmem>>, vector<4x16x1xf32>,
    %c0_9 = arith.constant 0 : index
    %c0_10 = arith.constant 0 : index
    %c0_11 = arith.constant 0 : index
    %6 = vector.load %arg2[%c0_9, %c0_10, %c0_11] : memref<4x16x16xf32, #tpu.memory_space<vmem>>, vector<4x16x16xf32>
    %c0_12 = arith.constant 0 : index
    %c0_13 = arith.constant 0 : index
    %c1_14 = arith.constant 1 : index
    %7 = vector.load %arg5[%c0_12, %c0_13, %c1_14] : memref<4x16x18xf32, #tpu.memory_space<vmem>>, vector<4x16x16xf32>
    tpu.vector_store %arg5[%c0_12, %c0_13, %c1_14], %6 {strides = array<i32>} : memref<4x16x18xf32, #tpu.memory_space<vmem>>, vector<4x16x16xf32>,
    %8 = vector.extract_strided_slice %6 {offsets = [0, 0, 1], sizes = [4, 16, 1], strides = [1, 1, 1]} : vector<4x16x16xf32> to vector<4x16x1xf32>
    %c0_15 = arith.constant 0 : index
    %c0_16 = arith.constant 0 : index
    %c0_17 = arith.constant 0 : index
    %9 = vector.load %arg5[%c0_15, %c0_16, %c0_17] : memref<4x16x18xf32, #tpu.memory_space<vmem>>, vector<4x16x1xf32>
    tpu.vector_store %arg5[%c0_15, %c0_16, %c0_17], %8 {strides = array<i32>} : memref<4x16x18xf32, #tpu.memory_space<vmem>>, vector<4x16x1xf32>,
    %10 = vector.extract_strided_slice %6 {offsets = [0, 0, 14], sizes = [4, 16, 1], strides = [1, 1, 1]} : vector<4x16x16xf32> to vector<4x16x1xf32>
    %c0_18 = arith.constant 0 : index
    %c0_19 = arith.constant 0 : index
    %c17_20 = arith.constant 17 : index
    %11 = vector.load %arg5[%c0_18, %c0_19, %c17_20] : memref<4x16x18xf32, #tpu.memory_space<vmem>>, vector<4x16x1xf32>
    tpu.vector_store %arg5[%c0_18, %c0_19, %c17_20], %10 {strides = array<i32>} : memref<4x16x18xf32, #tpu.memory_space<vmem>>, vector<4x16x1xf32>,
    %c0_21 = arith.constant 0 : index
    %c0_22 = arith.constant 0 : index
    %c0_23 = arith.constant 0 : index
    %12 = vector.load %arg4[%c0_21, %c0_22, %c0_23] : memref<4x16x18xf32, #tpu.memory_space<vmem>>, vector<4x16x16xf32>
    %c0_24 = arith.constant 0 : index
    %c0_25 = arith.constant 0 : index
    %c1_26 = arith.constant 1 : index
    %13 = vector.load %arg4[%c0_24, %c0_25, %c1_26] : memref<4x16x18xf32, #tpu.memory_space<vmem>>, vector<4x16x16xf32>
    %c0_27 = arith.constant 0 : index
    %c0_28 = arith.constant 0 : index
    %c2 = arith.constant 2 : index
    %14 = vector.load %arg4[%c0_27, %c0_28, %c2] : memref<4x16x18xf32, #tpu.memory_space<vmem>>, vector<4x16x16xf32>
    %c0_29 = arith.constant 0 : index
    %c0_30 = arith.constant 0 : index
    %c0_31 = arith.constant 0 : index
    %15 = vector.load %arg5[%c0_29, %c0_30, %c0_31] : memref<4x16x18xf32, #tpu.memory_space<vmem>>, vector<4x16x16xf32>
    %c0_32 = arith.constant 0 : index
    %c0_33 = arith.constant 0 : index
    %c1_34 = arith.constant 1 : index
    %16 = vector.load %arg5[%c0_32, %c0_33, %c1_34] : memref<4x16x18xf32, #tpu.memory_space<vmem>>, vector<4x16x16xf32>
    %c0_35 = arith.constant 0 : index
    %c0_36 = arith.constant 0 : index
    %c2_37 = arith.constant 2 : index
    %17 = vector.load %arg5[%c0_35, %c0_36, %c2_37] : memref<4x16x18xf32, #tpu.memory_space<vmem>>, vector<4x16x16xf32>
    %18 = arith.addf %12, %13 : vector<4x16x16xf32>
    %19 = arith.addf %18, %14 : vector<4x16x16xf32>
    %20 = arith.addf %15, %16 : vector<4x16x16xf32>
    %21 = arith.addf %20, %17 : vector<4x16x16xf32>
    %22 = arith.mulf %12, %12 : vector<4x16x16xf32>
    %23 = arith.mulf %13, %13 : vector<4x16x16xf32>
    %24 = arith.addf %22, %23 : vector<4x16x16xf32>
    %25 = arith.mulf %14, %14 : vector<4x16x16xf32>
    %26 = arith.addf %24, %25 : vector<4x16x16xf32>
    %27 = arith.mulf %15, %15 : vector<4x16x16xf32>
    %28 = arith.mulf %16, %16 : vector<4x16x16xf32>
    %29 = arith.addf %27, %28 : vector<4x16x16xf32>
    %30 = arith.mulf %17, %17 : vector<4x16x16xf32>
    %31 = arith.addf %29, %30 : vector<4x16x16xf32>
    %32 = arith.mulf %12, %15 : vector<4x16x16xf32>
    %33 = arith.mulf %13, %16 : vector<4x16x16xf32>
    %34 = arith.addf %32, %33 : vector<4x16x16xf32>
    %35 = arith.mulf %14, %17 : vector<4x16x16xf32>
    %36 = arith.addf %34, %35 : vector<4x16x16xf32>
    %c0_38 = arith.constant 0 : index
    %c1_39 = arith.constant 1 : index
    %c0_40 = arith.constant 0 : index
    %37 = vector.load %arg6[%c0_38, %c1_39, %c0_40] : memref<4x18x16xf32, #tpu.memory_space<vmem>>, vector<4x16x16xf32>
    tpu.vector_store %arg6[%c0_38, %c1_39, %c0_40], %19 {strides = array<i32>} : memref<4x18x16xf32, #tpu.memory_space<vmem>>, vector<4x16x16xf32>,
    %38 = vector.extract_strided_slice %19 {offsets = [0, 1, 0], sizes = [4, 1, 16], strides = [1, 1, 1]} : vector<4x16x16xf32> to vector<4x1x16xf32>
    %c0_41 = arith.constant 0 : index
    %c0_42 = arith.constant 0 : index
    %c0_43 = arith.constant 0 : index
    %39 = vector.load %arg6[%c0_41, %c0_42, %c0_43] : memref<4x18x16xf32, #tpu.memory_space<vmem>>, vector<4x1x16xf32>
    tpu.vector_store %arg6[%c0_41, %c0_42, %c0_43], %38 {strides = array<i32>} : memref<4x18x16xf32, #tpu.memory_space<vmem>>, vector<4x1x16xf32>,
    %40 = vector.extract_strided_slice %19 {offsets = [0, 14, 0], sizes = [4, 1, 16], strides = [1, 1, 1]} : vector<4x16x16xf32> to vector<4x1x16xf32>
    %c0_44 = arith.constant 0 : index
    %c17_45 = arith.constant 17 : index
    %c0_46 = arith.constant 0 : index
    %41 = vector.load %arg6[%c0_44, %c17_45, %c0_46] : memref<4x18x16xf32, #tpu.memory_space<vmem>>, vector<4x1x16xf32>
    tpu.vector_store %arg6[%c0_44, %c17_45, %c0_46], %40 {strides = array<i32>} : memref<4x18x16xf32, #tpu.memory_space<vmem>>, vector<4x1x16xf32>,
    %c0_47 = arith.constant 0 : index
    %c0_48 = arith.constant 0 : index
    %c0_49 = arith.constant 0 : index
    %42 = vector.load %arg6[%c0_47, %c0_48, %c0_49] : memref<4x18x16xf32, #tpu.memory_space<vmem>>, vector<4x16x16xf32>
    %c0_50 = arith.constant 0 : index
    %c1_51 = arith.constant 1 : index
    %c0_52 = arith.constant 0 : index
    %43 = vector.load %arg6[%c0_50, %c1_51, %c0_52] : memref<4x18x16xf32, #tpu.memory_space<vmem>>, vector<4x16x16xf32>
    %44 = arith.addf %42, %43 : vector<4x16x16xf32>
    %c0_53 = arith.constant 0 : index
    %c2_54 = arith.constant 2 : index
    %c0_55 = arith.constant 0 : index
    %45 = vector.load %arg6[%c0_53, %c2_54, %c0_55] : memref<4x18x16xf32, #tpu.memory_space<vmem>>, vector<4x16x16xf32>
    %46 = arith.addf %44, %45 : vector<4x16x16xf32>
    %cst = arith.constant 0.111111112 : f32
    %47 = vector.broadcast %cst : f32 to vector<4x16x16xf32>
    %48 = arith.mulf %46, %47 : vector<4x16x16xf32>
    %c0_56 = arith.constant 0 : index
    %c1_57 = arith.constant 1 : index
    %c0_58 = arith.constant 0 : index
    %49 = vector.load %arg6[%c0_56, %c1_57, %c0_58] : memref<4x18x16xf32, #tpu.memory_space<vmem>>, vector<4x16x16xf32>
    tpu.vector_store %arg6[%c0_56, %c1_57, %c0_58], %21 {strides = array<i32>} : memref<4x18x16xf32, #tpu.memory_space<vmem>>, vector<4x16x16xf32>,
    %50 = vector.extract_strided_slice %21 {offsets = [0, 1, 0], sizes = [4, 1, 16], strides = [1, 1, 1]} : vector<4x16x16xf32> to vector<4x1x16xf32>
    %c0_59 = arith.constant 0 : index
    %c0_60 = arith.constant 0 : index
    %c0_61 = arith.constant 0 : index
    %51 = vector.load %arg6[%c0_59, %c0_60, %c0_61] : memref<4x18x16xf32, #tpu.memory_space<vmem>>, vector<4x1x16xf32>
    tpu.vector_store %arg6[%c0_59, %c0_60, %c0_61], %50 {strides = array<i32>} : memref<4x18x16xf32, #tpu.memory_space<vmem>>, vector<4x1x16xf32>,
    %52 = vector.extract_strided_slice %21 {offsets = [0, 14, 0], sizes = [4, 1, 16], strides = [1, 1, 1]} : vector<4x16x16xf32> to vector<4x1x16xf32>
    %c0_62 = arith.constant 0 : index
    %c17_63 = arith.constant 17 : index
    %c0_64 = arith.constant 0 : index
    %53 = vector.load %arg6[%c0_62, %c17_63, %c0_64] : memref<4x18x16xf32, #tpu.memory_space<vmem>>, vector<4x1x16xf32>
    tpu.vector_store %arg6[%c0_62, %c17_63, %c0_64], %52 {strides = array<i32>} : memref<4x18x16xf32, #tpu.memory_space<vmem>>, vector<4x1x16xf32>,
    %c0_65 = arith.constant 0 : index
    %c0_66 = arith.constant 0 : index
    %c0_67 = arith.constant 0 : index
    %54 = vector.load %arg6[%c0_65, %c0_66, %c0_67] : memref<4x18x16xf32, #tpu.memory_space<vmem>>, vector<4x16x16xf32>
    %c0_68 = arith.constant 0 : index
    %c1_69 = arith.constant 1 : index
    %c0_70 = arith.constant 0 : index
    %55 = vector.load %arg6[%c0_68, %c1_69, %c0_70] : memref<4x18x16xf32, #tpu.memory_space<vmem>>, vector<4x16x16xf32>
    %56 = arith.addf %54, %55 : vector<4x16x16xf32>
    %c0_71 = arith.constant 0 : index
    %c2_72 = arith.constant 2 : index
    %c0_73 = arith.constant 0 : index
    %57 = vector.load %arg6[%c0_71, %c2_72, %c0_73] : memref<4x18x16xf32, #tpu.memory_space<vmem>>, vector<4x16x16xf32>
    %58 = arith.addf %56, %57 : vector<4x16x16xf32>
    %cst_74 = arith.constant 0.111111112 : f32
    %59 = vector.broadcast %cst_74 : f32 to vector<4x16x16xf32>
    %60 = arith.mulf %58, %59 : vector<4x16x16xf32>
    %c0_75 = arith.constant 0 : index
    %c1_76 = arith.constant 1 : index
    %c0_77 = arith.constant 0 : index
    %61 = vector.load %arg6[%c0_75, %c1_76, %c0_77] : memref<4x18x16xf32, #tpu.memory_space<vmem>>, vector<4x16x16xf32>
    tpu.vector_store %arg6[%c0_75, %c1_76, %c0_77], %26 {strides = array<i32>} : memref<4x18x16xf32, #tpu.memory_space<vmem>>, vector<4x16x16xf32>,
    %62 = vector.extract_strided_slice %26 {offsets = [0, 1, 0], sizes = [4, 1, 16], strides = [1, 1, 1]} : vector<4x16x16xf32> to vector<4x1x16xf32>
    %c0_78 = arith.constant 0 : index
    %c0_79 = arith.constant 0 : index
    %c0_80 = arith.constant 0 : index
    %63 = vector.load %arg6[%c0_78, %c0_79, %c0_80] : memref<4x18x16xf32, #tpu.memory_space<vmem>>, vector<4x1x16xf32>
    tpu.vector_store %arg6[%c0_78, %c0_79, %c0_80], %62 {strides = array<i32>} : memref<4x18x16xf32, #tpu.memory_space<vmem>>, vector<4x1x16xf32>,
    %64 = vector.extract_strided_slice %26 {offsets = [0, 14, 0], sizes = [4, 1, 16], strides = [1, 1, 1]} : vector<4x16x16xf32> to vector<4x1x16xf32>
    %c0_81 = arith.constant 0 : index
    %c17_82 = arith.constant 17 : index
    %c0_83 = arith.constant 0 : index
    %65 = vector.load %arg6[%c0_81, %c17_82, %c0_83] : memref<4x18x16xf32, #tpu.memory_space<vmem>>, vector<4x1x16xf32>
    tpu.vector_store %arg6[%c0_81, %c17_82, %c0_83], %64 {strides = array<i32>} : memref<4x18x16xf32, #tpu.memory_space<vmem>>, vector<4x1x16xf32>,
    %c0_84 = arith.constant 0 : index
    %c0_85 = arith.constant 0 : index
    %c0_86 = arith.constant 0 : index
    %66 = vector.load %arg6[%c0_84, %c0_85, %c0_86] : memref<4x18x16xf32, #tpu.memory_space<vmem>>, vector<4x16x16xf32>
    %c0_87 = arith.constant 0 : index
    %c1_88 = arith.constant 1 : index
    %c0_89 = arith.constant 0 : index
    %67 = vector.load %arg6[%c0_87, %c1_88, %c0_89] : memref<4x18x16xf32, #tpu.memory_space<vmem>>, vector<4x16x16xf32>
    %68 = arith.addf %66, %67 : vector<4x16x16xf32>
    %c0_90 = arith.constant 0 : index
    %c2_91 = arith.constant 2 : index
    %c0_92 = arith.constant 0 : index
    %69 = vector.load %arg6[%c0_90, %c2_91, %c0_92] : memref<4x18x16xf32, #tpu.memory_space<vmem>>, vector<4x16x16xf32>
    %70 = arith.addf %68, %69 : vector<4x16x16xf32>
    %cst_93 = arith.constant 0.111111112 : f32
    %71 = vector.broadcast %cst_93 : f32 to vector<4x16x16xf32>
    %72 = arith.mulf %70, %71 : vector<4x16x16xf32>
    %c0_94 = arith.constant 0 : index
    %c1_95 = arith.constant 1 : index
    %c0_96 = arith.constant 0 : index
    %73 = vector.load %arg6[%c0_94, %c1_95, %c0_96] : memref<4x18x16xf32, #tpu.memory_space<vmem>>, vector<4x16x16xf32>
    tpu.vector_store %arg6[%c0_94, %c1_95, %c0_96], %31 {strides = array<i32>} : memref<4x18x16xf32, #tpu.memory_space<vmem>>, vector<4x16x16xf32>,
    %74 = vector.extract_strided_slice %31 {offsets = [0, 1, 0], sizes = [4, 1, 16], strides = [1, 1, 1]} : vector<4x16x16xf32> to vector<4x1x16xf32>
    %c0_97 = arith.constant 0 : index
    %c0_98 = arith.constant 0 : index
    %c0_99 = arith.constant 0 : index
    %75 = vector.load %arg6[%c0_97, %c0_98, %c0_99] : memref<4x18x16xf32, #tpu.memory_space<vmem>>, vector<4x1x16xf32>
    tpu.vector_store %arg6[%c0_97, %c0_98, %c0_99], %74 {strides = array<i32>} : memref<4x18x16xf32, #tpu.memory_space<vmem>>, vector<4x1x16xf32>,
    %76 = vector.extract_strided_slice %31 {offsets = [0, 14, 0], sizes = [4, 1, 16], strides = [1, 1, 1]} : vector<4x16x16xf32> to vector<4x1x16xf32>
    %c0_100 = arith.constant 0 : index
    %c17_101 = arith.constant 17 : index
    %c0_102 = arith.constant 0 : index
    %77 = vector.load %arg6[%c0_100, %c17_101, %c0_102] : memref<4x18x16xf32, #tpu.memory_space<vmem>>, vector<4x1x16xf32>
    tpu.vector_store %arg6[%c0_100, %c17_101, %c0_102], %76 {strides = array<i32>} : memref<4x18x16xf32, #tpu.memory_space<vmem>>, vector<4x1x16xf32>,
    %c0_103 = arith.constant 0 : index
    %c0_104 = arith.constant 0 : index
    %c0_105 = arith.constant 0 : index
    %78 = vector.load %arg6[%c0_103, %c0_104, %c0_105] : memref<4x18x16xf32, #tpu.memory_space<vmem>>, vector<4x16x16xf32>
    %c0_106 = arith.constant 0 : index
    %c1_107 = arith.constant 1 : index
    %c0_108 = arith.constant 0 : index
    %79 = vector.load %arg6[%c0_106, %c1_107, %c0_108] : memref<4x18x16xf32, #tpu.memory_space<vmem>>, vector<4x16x16xf32>
    %80 = arith.addf %78, %79 : vector<4x16x16xf32>
    %c0_109 = arith.constant 0 : index
    %c2_110 = arith.constant 2 : index
    %c0_111 = arith.constant 0 : index
    %81 = vector.load %arg6[%c0_109, %c2_110, %c0_111] : memref<4x18x16xf32, #tpu.memory_space<vmem>>, vector<4x16x16xf32>
    %82 = arith.addf %80, %81 : vector<4x16x16xf32>
    %cst_112 = arith.constant 0.111111112 : f32
    %83 = vector.broadcast %cst_112 : f32 to vector<4x16x16xf32>
    %84 = arith.mulf %82, %83 : vector<4x16x16xf32>
    %c0_113 = arith.constant 0 : index
    %c1_114 = arith.constant 1 : index
    %c0_115 = arith.constant 0 : index
    %85 = vector.load %arg6[%c0_113, %c1_114, %c0_115] : memref<4x18x16xf32, #tpu.memory_space<vmem>>, vector<4x16x16xf32>
    tpu.vector_store %arg6[%c0_113, %c1_114, %c0_115], %36 {strides = array<i32>} : memref<4x18x16xf32, #tpu.memory_space<vmem>>, vector<4x16x16xf32>,
    %86 = vector.extract_strided_slice %36 {offsets = [0, 1, 0], sizes = [4, 1, 16], strides = [1, 1, 1]} : vector<4x16x16xf32> to vector<4x1x16xf32>
    %c0_116 = arith.constant 0 : index
    %c0_117 = arith.constant 0 : index
    %c0_118 = arith.constant 0 : index
    %87 = vector.load %arg6[%c0_116, %c0_117, %c0_118] : memref<4x18x16xf32, #tpu.memory_space<vmem>>, vector<4x1x16xf32>
    tpu.vector_store %arg6[%c0_116, %c0_117, %c0_118], %86 {strides = array<i32>} : memref<4x18x16xf32, #tpu.memory_space<vmem>>, vector<4x1x16xf32>,
    %88 = vector.extract_strided_slice %36 {offsets = [0, 14, 0], sizes = [4, 1, 16], strides = [1, 1, 1]} : vector<4x16x16xf32> to vector<4x1x16xf32>
    %c0_119 = arith.constant 0 : index
    %c17_120 = arith.constant 17 : index
    %c0_121 = arith.constant 0 : index
    %89 = vector.load %arg6[%c0_119, %c17_120, %c0_121] : memref<4x18x16xf32, #tpu.memory_space<vmem>>, vector<4x1x16xf32>
    tpu.vector_store %arg6[%c0_119, %c17_120, %c0_121], %88 {strides = array<i32>} : memref<4x18x16xf32, #tpu.memory_space<vmem>>, vector<4x1x16xf32>,
    %c0_122 = arith.constant 0 : index
    %c0_123 = arith.constant 0 : index
    %c0_124 = arith.constant 0 : index
    %90 = vector.load %arg6[%c0_122, %c0_123, %c0_124] : memref<4x18x16xf32, #tpu.memory_space<vmem>>, vector<4x16x16xf32>
    %c0_125 = arith.constant 0 : index
    %c1_126 = arith.constant 1 : index
    %c0_127 = arith.constant 0 : index
    %91 = vector.load %arg6[%c0_125, %c1_126, %c0_127] : memref<4x18x16xf32, #tpu.memory_space<vmem>>, vector<4x16x16xf32>
    %92 = arith.addf %90, %91 : vector<4x16x16xf32>
    %c0_128 = arith.constant 0 : index
    %c2_129 = arith.constant 2 : index
    %c0_130 = arith.constant 0 : index
    %93 = vector.load %arg6[%c0_128, %c2_129, %c0_130] : memref<4x18x16xf32, #tpu.memory_space<vmem>>, vector<4x16x16xf32>
    %94 = arith.addf %92, %93 : vector<4x16x16xf32>
    %cst_131 = arith.constant 0.111111112 : f32
    %95 = vector.broadcast %cst_131 : f32 to vector<4x16x16xf32>
    %96 = arith.mulf %94, %95 : vector<4x16x16xf32>
    %97 = arith.mulf %48, %48 : vector<4x16x16xf32>
    %98 = arith.subf %72, %97 : vector<4x16x16xf32>
    %99 = arith.mulf %60, %60 : vector<4x16x16xf32>
    %100 = arith.subf %84, %99 : vector<4x16x16xf32>
    %101 = arith.mulf %48, %60 : vector<4x16x16xf32>
    %102 = arith.subf %96, %101 : vector<4x16x16xf32>
    %cst_132 = arith.constant 2.000000e+00 : f32
    %103 = vector.broadcast %cst_132 : f32 to vector<4x16x16xf32>
    %104 = arith.mulf %103, %48 : vector<4x16x16xf32>
    %105 = arith.mulf %104, %60 : vector<4x16x16xf32>
    %cst_133 = arith.constant 9.99999974E-5 : f32
    %106 = vector.broadcast %cst_133 : f32 to vector<4x16x16xf32>
    %107 = arith.addf %105, %106 : vector<4x16x16xf32>
    %cst_134 = arith.constant 2.000000e+00 : f32
    %108 = vector.broadcast %cst_134 : f32 to vector<4x16x16xf32>
    %109 = arith.mulf %108, %102 : vector<4x16x16xf32>
    %cst_135 = arith.constant 8.99999984E-4 : f32
    %110 = vector.broadcast %cst_135 : f32 to vector<4x16x16xf32>
    %111 = arith.addf %109, %110 : vector<4x16x16xf32>
    %112 = arith.mulf %107, %111 : vector<4x16x16xf32>
    %113 = arith.mulf %48, %48 : vector<4x16x16xf32>
    %114 = arith.mulf %60, %60 : vector<4x16x16xf32>
    %115 = arith.addf %113, %114 : vector<4x16x16xf32>
    %cst_136 = arith.constant 9.99999974E-5 : f32
    %116 = vector.broadcast %cst_136 : f32 to vector<4x16x16xf32>
    %117 = arith.addf %115, %116 : vector<4x16x16xf32>
    %118 = arith.addf %98, %100 : vector<4x16x16xf32>
    %cst_137 = arith.constant 8.99999984E-4 : f32
    %119 = vector.broadcast %cst_137 : f32 to vector<4x16x16xf32>
    %120 = arith.addf %118, %119 : vector<4x16x16xf32>
    %121 = arith.mulf %117, %120 : vector<4x16x16xf32>
    %122 = tpu.reciprocal %121 : vector<4x16x16xf32> -> vector<4x16x16xf32>
    %123 = arith.mulf %112, %122 : vector<4x16x16xf32>
    %cst_138 = arith.constant 1.000000e+00 : f32
    %124 = vector.broadcast %cst_138 : f32 to vector<4x16x16xf32>
    %125 = arith.subf %124, %123 : vector<4x16x16xf32>
    %cst_139 = arith.constant 5.000000e-01 : f32
    %126 = vector.broadcast %cst_139 : f32 to vector<4x16x16xf32>
    %127 = arith.mulf %125, %126 : vector<4x16x16xf32>
    %cst_140 = arith.constant 0.000000e+00 : f32
    %cst_141 = arith.constant 1.000000e+00 : f32
    %128 = vector.broadcast %cst_140 : f32 to vector<4x16x16xf32>
    %129 = arith.maximumf %128, %127 : vector<4x16x16xf32>
    %130 = vector.broadcast %cst_141 : f32 to vector<4x16x16xf32>
    %131 = arith.minimumf %130, %129 : vector<4x16x16xf32>
    %c0_142 = arith.constant 0 : index
    %c0_143 = arith.constant 0 : index
    %c0_144 = arith.constant 0 : index
    %132 = vector.load %arg3[%c0_142, %c0_143, %c0_144] : memref<4x16x16xf32, #tpu.memory_space<vmem>>, vector<4x16x16xf32>
    tpu.vector_store %arg3[%c0_142, %c0_143, %c0_144], %131 {strides = array<i32>} : memref<4x16x16xf32, #tpu.memory_space<vmem>>, vector<4x16x16xf32>,
    return
  }
  func.func @transform_0(%arg0: i32) -> (i32, i32, i32) {
    %c0_i32 = arith.constant 0 : i32
    %c0_i32_0 = arith.constant 0 : i32
    %c0_i32_1 = arith.constant 0 : i32
    return %arg0, %c0_i32, %c0_i32_0 : i32, i32, i32
  }
  func.func @transform_1(%arg0: i32) -> (i32, i32, i32) {
    %c0_i32 = arith.constant 0 : i32
    %c0_i32_0 = arith.constant 0 : i32
    %c0_i32_1 = arith.constant 0 : i32
    return %arg0, %c0_i32, %c0_i32_0 : i32, i32, i32
  }
  func.func @transform_2(%arg0: i32) -> (i32, i32, i32) {
    %c0_i32 = arith.constant 0 : i32
    %c0_i32_0 = arith.constant 0 : i32
    %c0_i32_1 = arith.constant 0 : i32
    return %arg0, %c0_i32, %c0_i32_0 : i32, i32, i32
  }
}

</mosaic_0001>

<bundles_post_ra>
// kernel: tpu_custom_call.1
= control target key start
LH: loop header
LB: loop body
LE: loop exit
PB: predicated region body
PF: predicated region fallthrough
CT: control target
= control target key end

     0   :  { %7 = vsyncpa [#allocation6], 0  ;;  %s2954_s0 = inlined_call_operand.hbm [shape: f32[8,16,16], index: 0, kind: input, shape index: {}]   ;;  %s2955_s1 = inlined_call_operand.hbm [shape: f32[8,16,16], index: 1, kind: input, shape index: {}]   ;;  %s2956_s2 = inlined_call_operand.hbm [shape: f32[8,16,16], index: 2, kind: output, shape index: {}]  }
   0x1   :  { %9 = vsyncpa [#allocation6 + $0x1], 0 }
   0x2   :  { %10 = vsyncpa [#allocation9], 0 }
   0x3   :  { %12 = vsyncpa [#allocation9 + $0x1], 0 }
   0x4   :  { %13 = vsyncpa [#allocation7], 0 }
   0x5   :  { %15 = vsyncpa [#allocation7 + $0x1], 0  ;;  %s1714_s9 = smov 0   ;;  %s1716_s10 = smov 0  }
   0x6   :  { %s1718_s11 = smov 0   ;;  %s1720_s12 = smov 0  }
   0x7 LB: > { %s1735_s13 = sadd.s32 4294967295, %s1686_s12   ;;  %s1460_s14 = sadd.s32 4294967294, %s1686_s12   ;;  %s1686_s12 = sphi %s1720_s12, %s3043_s12   ;;  %s1682_s11 = sphi %s1718_s11, %s3042_s11   ;;  %s1678_s10 = sphi %s1716_s10, %s3041_s10   ;;  %s1674_s9 = sphi %s1714_s9, %s3040_s9  }
   0x8   : > { %s1739_s15 = sadd.s32 1, %s1686_s12   ;;  %s28_s16 = sadd.s32 1, %s1682_s11 }
   0x9   : > { %s25_s17 = ssub.s32 %s1686_s12, %s1739_s15  ;;  %p35_p0 = scmp.ne.s32.totalorder %s1682_s11, %s1678_s10 }
   0xa   : > { %p26_p1 = scmp.eq.s32.totalorder %s25_s17, 0  ;;  %p36_p2 = scmp.eq.s32.totalorder %s1686_s12, 0 }
   0xb   : > { %p41_p3 = scmp.ne.s32.totalorder %s1678_s10, %s1674_s9  ;;  %p42_p4 = scmp.eq.s32.totalorder %s1735_s13, 0 }
   0xc   : > { %s1751_s18 = scalar_select %p26_p1, %s1682_s11, %s28_s16  }
   0xd   : > { %p1753_p5 = por %p36_p2, %p35_p0  ;;  %p1757_p6 = por %p42_p4, %p41_p3 }
   0xe   : > { %p91_p7 = scmp.eq.s32.totalorder %s1735_s13, 1  ;;  %p97_p8 = scmp.eq.s32.totalorder %s1460_s14, 1 }
   0xf   : > { %s2971_s20 = scalar_select %p1757_p6, 1, 0 }
  0x10   : > { %p1504_p10 = scmp.lt.s32.totalorder %s1686_s12, 2  ;;  %p1764_p11 = por %p91_p7, %p35_p0 }
  0x11   : > { %p1768_p12 = por %p97_p8, %p41_p3  ;;  %s1773_s23 = sand.u32 1, %s1682_s11  }
  0x12   : > { %s2972_s21 = scalar_select %p1764_p11, 1, 0 }
  0x13   : > { %s2973_s22 = scalar_select %p1768_p12, 1, 0 }
  0x14   : > { %s1482_s24 = sshll.u32 %s1686_s12, 10  ;;  %s1463_s25 = sshll.u32 %s1773_s23, 6 }
  0x15   : > { %s1782_s28 = scalar_lea.hbm %s2954_s0, %s1482_s24  ;;  %s121_s29 = scalar_lea.vmem [#allocation5], %s1463_s25 }
  0x16   : > { %s129_s30 = sshll.u32 %s121_s29, 4  ;;  %p1788_p13 = pnand %p1504_p10, %p1753_p5  ;;  %s1792_s30 = int_to_ptr.vmem [resolvable:$true] %s129_s30 }
  0x17   : > { %s118_s4 = scalar_lea.sflag [#allocation6], %s1773_s23  ;;  %s1562_s5 = scalar_lea.hbm %s1782_s28, 1024 }
  0x18   : > { %p1563_p0 = scmp.ne.s32.totalorder %s1782_s28, %s1562_s5  ;;  %p1564_p1 = pneg %p1788_p13 }
  0x19   : > { %s1567_s8 = scalar_lea.hbm %s2954_s0, 2048  ;;  %p1568_p4 = scmp.lt.s32.totalorder %s1782_s28, %s2954_s0 }
  0x1a   : > { %p1565_p2 = pnand %p1564_p1, %p1563_p0  ;;  %p1569_p5 = scmp.lt.s32.totalorder %s1567_s8, %s1562_s5 }
  0x1c   : > { %p1566_p3 = pneg %p1565_p2  ;;  %p1570_p7 = por %p1569_p5, %p1568_p4 }
  0x1e   : > { %p1571_p8 = pnand %p1570_p7, %p1566_p3 }
  0x20   : > { %1574 = shalt.err (!%p1571_p8)
}
  0x21   : > { %s1575_s17 = scalar_lea.vmem %s1792_s30, 1024  ;;  %s1688_s19 = smov [#allocation5]  }
  0x22   : > { %p1576_p10 = scmp.ne.s32.totalorder %s1792_s30, %s1575_s17  ;;  %s1580_s26 = sshll.u32 %s1688_s19, 4  ;;  %s1581_s26 = int_to_ptr.vmem [resolvable:$false] %s1580_s26 }
  0x23   : > { %s1582_s27 = scalar_lea.vmem %s1581_s26, 2048  ;;  %p1583_p9 = scmp.lt.s32.totalorder %s1792_s30, %s1581_s26 }
  0x24   : > { %p1578_p0 = pnand %p1576_p10, %p1564_p1  ;;  %p1584_p12 = scmp.lt.s32.totalorder %s1582_s27, %s1575_s17 }
  0x26   : > { %p1579_p2 = pneg %p1578_p0  ;;  %p1585_p11 = por %p1584_p12, %p1583_p9 }
  0x28   : > { %p1586_p4 = pnand %p1585_p11, %p1579_p2 }
  0x2a   : > { %1589 = shalt.err (!%p1586_p4)
}
  0x2b   : > { %s1689_s29 = smov 128   ;;  %s1690_s5 = smov 8  }
  0x2c   : > { %1496 = dma.hbm_to_vmem [thread:$0]  (!%p1788_p13), %s1782_s28, 1024, %s1792_s30, %s118_s4, %s1689_s29, %s1689_s29, %s1690_s5  }
  0x2d   : > { %p1471_p9 = scmp.ge.s32.totalorder %s1686_s12, 1  ;;  %p159_p11 = scmp.lt.s32.totalorder %s1686_s12, 3 }
  0x2e   : > { %s1835_s14 = scalar_lea.hbm %s2955_s1, %s1482_s24  ;;  %s143_s16 = scalar_lea.vmem [#allocation8], %s1463_s25 }
  0x2f   : > { %p1826_p12 = pnand %p1471_p9, %p159_p11  ;;  %s151_s17 = sshll.u32 %s143_s16, 4  ;;  %s1839_s17 = int_to_ptr.vmem [resolvable:$true] %s151_s17 }
  0x30   : > { %s140_s28 = scalar_lea.sflag [#allocation9], %s1773_s23  ;;  %s1590_s30 = scalar_lea.hbm %s1835_s14, 1024 }
  0x31   : > { %p1591_p3 = scmp.ne.s32.totalorder %s1835_s14, %s1590_s30  ;;  %s1595_s24 = scalar_lea.hbm %s2955_s1, 2048 }
  0x32   : > { %p1596_p8 = scmp.lt.s32.totalorder %s1835_s14, %s2955_s1  ;;  %p1597_p10 = scmp.lt.s32.totalorder %s1595_s24, %s1590_s30 }
  0x33   : > { %p1593_p5 = pnand %p1591_p3, %p1564_p1 }
  0x34   : > { %p1598_p0 = por %p1597_p10, %p1596_p8 }
  0x35   : > { %p1594_p7 = pneg %p1593_p5 }
  0x37   : > { %p1599_p2 = pnand %p1598_p0, %p1594_p7 }
  0x39   : > { %1602 = shalt.err (!%p1599_p2)
}
  0x3a   : > { %s1603_s23 = scalar_lea.vmem %s1839_s17, 1024  ;;  %s1691_s25 = smov [#allocation8]  }
  0x3b   : > { %p1604_p4 = scmp.ne.s32.totalorder %s1839_s17, %s1603_s23  ;;  %s1608_s7 = sshll.u32 %s1691_s25, 4  ;;  %s1609_s7 = int_to_ptr.vmem [resolvable:$false] %s1608_s7 }
  0x3c   : > { %s1610_s8 = scalar_lea.vmem %s1609_s7, 2048  ;;  %p1611_p3 = scmp.lt.s32.totalorder %s1839_s17, %s1609_s7 }
  0x3d   : > { %p1606_p9 = pnand %p1604_p4, %p1564_p1  ;;  %p1612_p5 = scmp.lt.s32.totalorder %s1610_s8, %s1603_s23 }
  0x3f   : > { %p1607_p11 = pneg %p1606_p9  ;;  %p1613_p6 = por %p1612_p5, %p1611_p3 }
  0x41   : > { %p1614_p8 = pnand %p1613_p6, %p1607_p11 }
  0x43   : > { %1617 = shalt.err (!%p1614_p8)
}
  0x44   : > { %1499 = dma.hbm_to_vmem [thread:$0]  (!%p1788_p13), %s1835_s14, 1024, %s1839_s17, %s140_s28, %s1689_s29, %s1689_s29, %s1690_s5  }
  0x45   : > { %163 = sbr.rel (%p1826_p12) target bundleno = 573 (0x23d), region = 28 }
  0x4a   : > { %s1870_s16 = sand.u32 1, %s1678_s10   ;;  %p2976_p6 = scmp.ne.s32.totalorder %s2971_s20, 0 }
  0x4b   : > { %s1873_s30 = sshll.u32 %s1870_s16, 6  ;;  %s166_s4 = scalar_lea.sflag [#allocation6], %s1870_s16 }
  0x4c   : > { %s169_s3 = scalar_lea.vmem [#allocation5], %s1873_s30 }
  0x4d   : > { %1661 = dma.done.wait (%p2976_p6), %s166_s4, 1024  }
  0x4e   : > { %1663 = vsyncadd (%p2976_p6), %s166_s4, 4294966272  ;;  %s175_s29 = scalar_lea.sflag [#allocation9], %s1870_s16  ;;  %s1883_s5 = scalar_lea.vmem [#allocation8], %s1873_s30 }
  0x4f   : > { %1665 = dma.done.wait (%p2976_p6), %s175_s29, 1024  }
  0x50   : > { %1667 = vsyncadd (%p2976_p6), %s175_s29, 4294966272  ;;  %v209_v0 = vld [vmem:[%s169_s3 + $0x10] sm:$0xff]  ;;  %v207_v1 = vld [vmem:[%s169_s3] sm:$0xff]  ;;  %s1692_s6 = smov 1   ;;  %s1693_s20 = smov 127   ;;  %vm247_vm0 = vcmask 138248  }
  0x51   : > { %227 = vrot.lane.b32.xlu1 %v209_v0, %s1692_s6  ;;  %223 = vrot.lane.b32.xlu0 %v207_v1, %s1692_s6  ;;  %v210_v2 = vld [vmem:[%s169_s3 + $0x18] sm:$0xff]  ;;  %v208_v3 = vld [vmem:[%s169_s3 + $0x8] sm:$0xff]  ;;  %s1694_s14 = smov 3   ;;  %vm280_vm1 = vcmask 7168   ;;  %vm313_vm2 = vcmask 146568   ;;  %s1695_s17 = smov 126  }
  0x52   : > { %v212_v4 = vld [vmem:[%s169_s3 + $0x28] sm:$0xff]  ;;  %v211_v5 = vld [vmem:[%s169_s3 + $0x20] sm:$0xff]  ;;  %v214_v6 = vld [vmem:[%s169_s3 + $0x38] sm:$0xff]  ;;  %vm834_vm3 = vcmask 130048   ;;  %vm848_vm4 = vcmask 129030   ;;  %vm843_vm5 = vcmask 123905  }
  0x53   : > { %v213_v7 = vld [vmem:[%s169_s3 + $0x30] sm:$0xff]  ;;  %v323_v8 = vld [vmem:[%s1883_s5 + $0x8] sm:$0xff]  ;;  %v322_v9 = vld [vmem:[%s1883_s5] sm:$0xff]  ;;  %s2885_s28 = scalar_lea.vmem [#allocation10], %s1873_s30  ;;  %s1486_s19 = sshll.u32 %s1735_s13, 10 }
  0x54   : > { %v325_v10 = vld [vmem:[%s1883_s5 + $0x18] sm:$0xff]  ;;  %v324_v11 = vld [vmem:[%s1883_s5 + $0x10] sm:$0xff]  ;;  %v327_v12 = vld [vmem:[%s1883_s5 + $0x28] sm:$0xff]  ;;  %s1364_s24 = sshll.u32 %s2885_s28, 4  ;;  %s2905_s23 = scalar_lea.hbm %s2956_s2, %s1486_s19  ;;  %s2907_s24 = int_to_ptr.vmem [resolvable:$true] %s1364_s24 }
  0x55   : > { %229 = vrot.lane.b32.xlu1 %v210_v2, %s1692_s6  ;;  %225 = vrot.lane.b32.xlu0 %v208_v3, %s1692_s6  ;;  %v326_v13 = vld [vmem:[%s1883_s5 + $0x20] sm:$0xff]  ;;  %v329_v14 = vld [vmem:[%s1883_s5 + $0x38] sm:$0xff]  ;;  %s1350_s13 = scalar_lea.sflag [#allocation7], %s1870_s16  ;;  %s1618_s25 = scalar_lea.vmem %s2907_s24, 1024 }
  0x56   : > { %v328_v15 = vld [vmem:[%s1883_s5 + $0x30] sm:$0xff]  ;;  %p1619_p13 = scmp.ne.s32.totalorder %s2907_s24, %s1618_s25  ;;  %p3037_p1 = scmp.ne.s32.totalorder %s2972_s21, 0 }
  0x57   : > { %s1696_s7 = smov [#allocation10]  }
  0x58   : > { %p1620_p12 = pnand %p1619_p13, %p3037_p1  ;;  %s1622_s8 = sshll.u32 %s1696_s7, 4  ;;  %s1623_s8 = int_to_ptr.vmem [resolvable:$false] %s1622_s8 }
  0x59   : > { %233 = vrot.lane.b32.xlu1 %v212_v4, %s1692_s6  ;;  %231 = vrot.lane.b32.xlu0 %v211_v5, %s1692_s6  ;;  %s1624_s30 = scalar_lea.vmem %s1623_s8, 2048  ;;  %p1625_p10 = scmp.lt.s32.totalorder %s2907_s24, %s1623_s8 }
  0x5a   : > { %p1621_p7 = pneg %p1620_p12  ;;  %p1626_p0 = scmp.lt.s32.totalorder %s1624_s30, %s1618_s25 }
  0x5c   : > { %p1627_p2 = por %p1626_p0, %p1625_p10 }
  0x5d   : > { %237 = vrot.lane.b32.xlu1 %v214_v6, %s1692_s6  ;;  %235 = vrot.lane.b32.xlu0 %v213_v7, %s1692_s6 }
  0x5e   : > { %p1628_p4 = pnand %p1627_p2, %p1621_p7 }
  0x61   : > { %258 = vrot.lane.b32.xlu1 %v208_v3, %s1693_s20  ;;  %256 = vrot.lane.b32.xlu0 %v207_v1, %s1693_s20 }
  0x65   : > { %262 = vrot.lane.b32.xlu1 %v210_v2, %s1693_s20  ;;  %260 = vrot.lane.b32.xlu0 %v209_v0, %s1693_s20 }
  0x69   : > { %266 = vrot.lane.b32.xlu1 %v212_v4, %s1693_s20  ;;  %264 = vrot.lane.b32.xlu0 %v211_v5, %s1693_s20 }
  0x6d   : > { %270 = vrot.lane.b32.xlu1 %v214_v6, %s1693_s20  ;;  %268 = vrot.lane.b32.xlu0 %v213_v7, %s1693_s20 }
  0x71   : > { %291 = vrot.lane.b32.xlu1 %v208_v3, %s1694_s14  ;;  %289 = vrot.lane.b32.xlu0 %v207_v1, %s1694_s14 }
  0x75   : > { %295 = vrot.lane.b32.xlu1 %v210_v2, %s1694_s14  ;;  %293 = vrot.lane.b32.xlu0 %v209_v0, %s1694_s14 }
  0x79   : > { %299 = vrot.lane.b32.xlu1 %v212_v4, %s1694_s14  ;;  %297 = vrot.lane.b32.xlu0 %v211_v5, %s1694_s14 }
  0x7d   : > { %303 = vrot.lane.b32.xlu1 %v214_v6, %s1694_s14  ;;  %301 = vrot.lane.b32.xlu0 %v213_v7, %s1694_s14 }
  0x81   : > { %340 = vrot.lane.b32.xlu1 %v323_v8, %s1692_s6  ;;  %338 = vrot.lane.b32.xlu0 %v322_v9, %s1692_s6 }
  0x85   : > { %344 = vrot.lane.b32.xlu1 %v325_v10, %s1692_s6  ;;  %342 = vrot.lane.b32.xlu0 %v324_v11, %s1692_s6 }
  0x89   : > { %348 = vrot.lane.b32.xlu1 %v327_v12, %s1692_s6  ;;  %346 = vrot.lane.b32.xlu0 %v326_v13, %s1692_s6 }
  0x8d   : > { %352 = vrot.lane.b32.xlu1 %v329_v14, %s1692_s6  ;;  %350 = vrot.lane.b32.xlu0 %v328_v15, %s1692_s6 }
  0x91   : > { %372 = vrot.lane.b32.xlu1 %v323_v8, %s1693_s20  ;;  %370 = vrot.lane.b32.xlu0 %v322_v9, %s1693_s20 }
  0x95   : > { %376 = vrot.lane.b32.xlu1 %v325_v10, %s1693_s20  ;;  %374 = vrot.lane.b32.xlu0 %v324_v11, %s1693_s20 }
  0x99   : > { %380 = vrot.lane.b32.xlu1 %v327_v12, %s1693_s20  ;;  %378 = vrot.lane.b32.xlu0 %v326_v13, %s1693_s20 }
  0x9d   : > { %384 = vrot.lane.b32.xlu1 %v329_v14, %s1693_s20  ;;  %382 = vrot.lane.b32.xlu0 %v328_v15, %s1693_s20 }
  0xa1   : > { %404 = vrot.lane.b32.xlu1 %v323_v8, %s1694_s14  ;;  %402 = vrot.lane.b32.xlu0 %v322_v9, %s1694_s14 }
  0xa5   : > { %408 = vrot.lane.b32.xlu1 %v325_v10, %s1694_s14  ;;  %406 = vrot.lane.b32.xlu0 %v324_v11, %s1694_s14 }
  0xa9   : > { %412 = vrot.lane.b32.xlu1 %v327_v12, %s1694_s14  ;;  %410 = vrot.lane.b32.xlu0 %v326_v13, %s1694_s14 }
  0xad   : > { %416 = vrot.lane.b32.xlu1 %v329_v14, %s1694_s14  ;;  %414 = vrot.lane.b32.xlu0 %v328_v15, %s1694_s14 }
  0xc3   : > { %v228_v16 = vpop.permute.xlu1 %227  ;;  %v224_v17 = vpop.permute.xlu0 %223 }
  0xc4   : > { %250 = vst.msk [vmem:[#allocation2 + $0x10] sm:$0xff] %vm247_vm0, %v228_v16  ;;  %248 = vst.msk [vmem:[#allocation2] sm:$0xff] %vm247_vm0, %v224_v17 }
  0xc7   : > { %v230_v18 = vpop.permute.xlu1 %229  ;;  %v226_v19 = vpop.permute.xlu0 %225 }
  0xc8   : > { %251 = vst.msk [vmem:[#allocation2 + $0x18] sm:$0xff] %vm247_vm0, %v230_v18  ;;  %249 = vst.msk [vmem:[#allocation2 + $0x8] sm:$0xff] %vm247_vm0, %v226_v19 }
  0xcb   : > { %v234_v20 = vpop.permute.xlu1 %233  ;;  %v232_v21 = vpop.permute.xlu0 %231 }
  0xcc   : > { %253 = vst.msk [vmem:[#allocation2 + $0x28] sm:$0xff] %vm247_vm0, %v234_v20  ;;  %252 = vst.msk [vmem:[#allocation2 + $0x20] sm:$0xff] %vm247_vm0, %v232_v21 }
  0xcf   : > { %v238_v22 = vpop.permute.xlu1 %237  ;;  %v236_v23 = vpop.permute.xlu0 %235 }
  0xd0   : > { %255 = vst.msk [vmem:[#allocation2 + $0x38] sm:$0xff] %vm247_vm0, %v238_v22  ;;  %254 = vst.msk [vmem:[#allocation2 + $0x30] sm:$0xff] %vm247_vm0, %v236_v23 }
  0xd3   : > { %v259_v24 = vpop.permute.xlu1 %258  ;;  %v257_v25 = vpop.permute.xlu0 %256 }
  0xd4   : > { %282 = vst.msk [vmem:[#allocation2 + $0x8] sm:$0xff] %vm280_vm1, %v259_v24  ;;  %281 = vst.msk [vmem:[#allocation2] sm:$0xff] %vm280_vm1, %v257_v25 }
  0xd7   : > { %v263_v26 = vpop.permute.xlu1 %262  ;;  %v261_v27 = vpop.permute.xlu0 %260 }
  0xd8   : > { %284 = vst.msk [vmem:[#allocation2 + $0x18] sm:$0xff] %vm280_vm1, %v263_v26  ;;  %283 = vst.msk [vmem:[#allocation2 + $0x10] sm:$0xff] %vm280_vm1, %v261_v27 }
  0xdb   : > { %v267_v28 = vpop.permute.xlu1 %266  ;;  %v265_v29 = vpop.permute.xlu0 %264 }
  0xdc   : > { %286 = vst.msk [vmem:[#allocation2 + $0x28] sm:$0xff] %vm280_vm1, %v267_v28  ;;  %285 = vst.msk [vmem:[#allocation2 + $0x20] sm:$0xff] %vm280_vm1, %v265_v29 }
  0xdf   : > { %v271_v30 = vpop.permute.xlu1 %270  ;;  %v269_v31 = vpop.permute.xlu0 %268 }
  0xe0   : > { %288 = vst.msk [vmem:[#allocation2 + $0x38] sm:$0xff] %vm280_vm1, %v271_v30  ;;  %287 = vst.msk [vmem:[#allocation2 + $0x30] sm:$0xff] %vm280_vm1, %v269_v31 }
  0xe3   : > { %v292_v32 = vpop.permute.xlu1 %291  ;;  %v290_v33 = vpop.permute.xlu0 %289 }
  0xe4   : > { %315 = vst.msk [vmem:[#allocation2 + $0x8] sm:$0xff] %vm313_vm2, %v292_v32  ;;  %314 = vst.msk [vmem:[#allocation2] sm:$0xff] %vm313_vm2, %v290_v33 }
  0xe7   : > { %v296_v34 = vpop.permute.xlu1 %295  ;;  %v294_v35 = vpop.permute.xlu0 %293 }
  0xe8   : > { %317 = vst.msk [vmem:[#allocation2 + $0x18] sm:$0xff] %vm313_vm2, %v296_v34  ;;  %316 = vst.msk [vmem:[#allocation2 + $0x10] sm:$0xff] %vm313_vm2, %v294_v35 }
  0xeb   : > { %v300_v36 = vpop.permute.xlu1 %299  ;;  %v298_v37 = vpop.permute.xlu0 %297  ;;  %v1965_v38 = vld [vmem:[#allocation2 + $0x8] sm:$0xff]  ;;  %v1967_v39 = vld [vmem:[#allocation2] sm:$0xff] }
  0xec   : > { %319 = vst.msk [vmem:[#allocation2 + $0x28] sm:$0xff] %vm313_vm2, %v300_v36  ;;  %318 = vst.msk [vmem:[#allocation2 + $0x20] sm:$0xff] %vm313_vm2, %v298_v37  ;;  %460 = vrot.lane.b32.xlu1 %v1965_v38, %s1693_s20  ;;  %458 = vrot.lane.b32.xlu0 %v1967_v39, %s1693_s20  ;;  %v2091_v16 = vmul.f32 %v1965_v38, %v1965_v38  ;;  %v2095_v17 = vmul.f32 %v1967_v39, %v1967_v39 }
  0xef   : > { %v304_v40 = vpop.permute.xlu1 %303  ;;  %v302_v41 = vpop.permute.xlu0 %301  ;;  %v1975_v42 = vld [vmem:[#allocation2 + $0x18] sm:$0xff]  ;;  %v1977_v43 = vld [vmem:[#allocation2 + $0x10] sm:$0xff] }
  0xf0   : > { %321 = vst.msk [vmem:[#allocation2 + $0x38] sm:$0xff] %vm313_vm2, %v304_v40  ;;  %320 = vst.msk [vmem:[#allocation2 + $0x30] sm:$0xff] %vm313_vm2, %v302_v41  ;;  %464 = vrot.lane.b32.xlu1 %v1975_v42, %s1693_s20  ;;  %462 = vrot.lane.b32.xlu0 %v1977_v43, %s1693_s20  ;;  %v2103_v18 = vmul.f32 %v1975_v42, %v1975_v42  ;;  %v2107_v19 = vmul.f32 %v1977_v43, %v1977_v43 }
  0xf3   : > { %v341_v44 = vpop.permute.xlu1 %340  ;;  %v339_v45 = vpop.permute.xlu0 %338  ;;  %v1985_v46 = vld [vmem:[#allocation2 + $0x28] sm:$0xff]  ;;  %v1987_v47 = vld [vmem:[#allocation2 + $0x20] sm:$0xff] }
  0xf4   : > { %363 = vst.msk [vmem:[#allocation3 + $0x8] sm:$0xff] %vm247_vm0, %v341_v44  ;;  %362 = vst.msk [vmem:[#allocation3] sm:$0xff] %vm247_vm0, %v339_v45  ;;  %468 = vrot.lane.b32.xlu1 %v1985_v46, %s1693_s20  ;;  %466 = vrot.lane.b32.xlu0 %v1987_v47, %s1693_s20  ;;  %v2115_v20 = vmul.f32 %v1985_v46, %v1985_v46  ;;  %v2119_v21 = vmul.f32 %v1987_v47, %v1987_v47 }
  0xf7   : > { %v345_v48 = vpop.permute.xlu1 %344  ;;  %v343_v49 = vpop.permute.xlu0 %342  ;;  %v1995_v50 = vld [vmem:[#allocation2 + $0x38] sm:$0xff]  ;;  %v1997_v51 = vld [vmem:[#allocation2 + $0x30] sm:$0xff] }
  0xf8   : > { %365 = vst.msk [vmem:[#allocation3 + $0x18] sm:$0xff] %vm247_vm0, %v345_v48  ;;  %364 = vst.msk [vmem:[#allocation3 + $0x10] sm:$0xff] %vm247_vm0, %v343_v49  ;;  %472 = vrot.lane.b32.xlu1 %v1995_v50, %s1693_s20  ;;  %470 = vrot.lane.b32.xlu0 %v1997_v51, %s1693_s20  ;;  %v2127_v22 = vmul.f32 %v1995_v50, %v1995_v50  ;;  %v2131_v23 = vmul.f32 %v1997_v51, %v1997_v51 }
  0xfb   : > { %v349_v52 = vpop.permute.xlu1 %348  ;;  %v347_v53 = vpop.permute.xlu0 %346 }
  0xfc   : > { %367 = vst.msk [vmem:[#allocation3 + $0x28] sm:$0xff] %vm247_vm0, %v349_v52  ;;  %366 = vst.msk [vmem:[#allocation3 + $0x20] sm:$0xff] %vm247_vm0, %v347_v53  ;;  %492 = vrot.lane.b32.xlu1 %v1965_v38, %s1695_s17  ;;  %490 = vrot.lane.b32.xlu0 %v1967_v39, %s1695_s17 }
  0xff   : > { %v353_v54 = vpop.permute.xlu1 %352  ;;  %v351_v55 = vpop.permute.xlu0 %350 }
 0x100   : > { %369 = vst.msk [vmem:[#allocation3 + $0x38] sm:$0xff] %vm247_vm0, %v353_v54  ;;  %368 = vst.msk [vmem:[#allocation3 + $0x30] sm:$0xff] %vm247_vm0, %v351_v55  ;;  %496 = vrot.lane.b32.xlu1 %v1975_v42, %s1695_s17  ;;  %494 = vrot.lane.b32.xlu0 %v1977_v43, %s1695_s17 }
 0x103   : > { %v373_v56 = vpop.permute.xlu1 %372  ;;  %v371_v57 = vpop.permute.xlu0 %370 }
 0x104   : > { %395 = vst.msk [vmem:[#allocation3 + $0x8] sm:$0xff] %vm280_vm1, %v373_v56  ;;  %394 = vst.msk [vmem:[#allocation3] sm:$0xff] %vm280_vm1, %v371_v57  ;;  %500 = vrot.lane.b32.xlu1 %v1985_v46, %s1695_s17  ;;  %498 = vrot.lane.b32.xlu0 %v1987_v47, %s1695_s17 }
 0x107   : > { %v377_v58 = vpop.permute.xlu1 %376  ;;  %v375_v59 = vpop.permute.xlu0 %374 }
 0x108   : > { %397 = vst.msk [vmem:[#allocation3 + $0x18] sm:$0xff] %vm280_vm1, %v377_v58  ;;  %396 = vst.msk [vmem:[#allocation3 + $0x10] sm:$0xff] %vm280_vm1, %v375_v59  ;;  %504 = vrot.lane.b32.xlu1 %v1995_v50, %s1695_s17  ;;  %502 = vrot.lane.b32.xlu0 %v1997_v51, %s1695_s17 }
 0x10b   : > { %v381_v60 = vpop.permute.xlu1 %380  ;;  %v379_v61 = vpop.permute.xlu0 %378 }
 0x10c   : > { %399 = vst.msk [vmem:[#allocation3 + $0x28] sm:$0xff] %vm280_vm1, %v381_v60  ;;  %398 = vst.msk [vmem:[#allocation3 + $0x20] sm:$0xff] %vm280_vm1, %v379_v61 }
 0x10f   : > { %v385_v62 = vpop.permute.xlu1 %384  ;;  %v383_v63 = vpop.permute.xlu0 %382 }
 0x110   : > { %401 = vst.msk [vmem:[#allocation3 + $0x38] sm:$0xff] %vm280_vm1, %v385_v62  ;;  %400 = vst.msk [vmem:[#allocation3 + $0x30] sm:$0xff] %vm280_vm1, %v383_v63 }
 0x113   : > { %v405_v0 = vpop.permute.xlu1 %404  ;;  %v403_v1 = vpop.permute.xlu0 %402 }
 0x114   : > { %427 = vst.msk [vmem:[#allocation3 + $0x8] sm:$0xff] %vm313_vm2, %v405_v0  ;;  %426 = vst.msk [vmem:[#allocation3] sm:$0xff] %vm313_vm2, %v403_v1 }
 0x117   : > { %v409_v2 = vpop.permute.xlu1 %408  ;;  %v407_v3 = vpop.permute.xlu0 %406 }
 0x118   : > { %429 = vst.msk [vmem:[#allocation3 + $0x18] sm:$0xff] %vm313_vm2, %v409_v2  ;;  %428 = vst.msk [vmem:[#allocation3 + $0x10] sm:$0xff] %vm313_vm2, %v407_v3 }
 0x11b   : > { %v413_v4 = vpop.permute.xlu1 %412  ;;  %v411_v5 = vpop.permute.xlu0 %410  ;;  %v2037_v6 = vld [vmem:[#allocation3 + $0x8] sm:$0xff]  ;;  %v2039_v7 = vld [vmem:[#allocation3] sm:$0xff] }
 0x11c   : > { %431 = vst.msk [vmem:[#allocation3 + $0x28] sm:$0xff] %vm313_vm2, %v413_v4  ;;  %430 = vst.msk [vmem:[#allocation3 + $0x20] sm:$0xff] %vm313_vm2, %v411_v5  ;;  %532 = vrot.lane.b32.xlu1 %v2037_v6, %s1693_s20  ;;  %530 = vrot.lane.b32.xlu0 %v2039_v7, %s1693_s20  ;;  %v2155_v24 = vmul.f32 %v2037_v6, %v2037_v6  ;;  %v2159_v25 = vmul.f32 %v2039_v7, %v2039_v7 }
 0x11f   : > { %v417_v8 = vpop.permute.xlu1 %416  ;;  %v415_v9 = vpop.permute.xlu0 %414  ;;  %v2047_v10 = vld [vmem:[#allocation3 + $0x18] sm:$0xff]  ;;  %v2049_v11 = vld [vmem:[#allocation3 + $0x10] sm:$0xff] }
 0x120   : > { %433 = vst.msk [vmem:[#allocation3 + $0x38] sm:$0xff] %vm313_vm2, %v417_v8  ;;  %432 = vst.msk [vmem:[#allocation3 + $0x30] sm:$0xff] %vm313_vm2, %v415_v9  ;;  %536 = vrot.lane.b32.xlu1 %v2047_v10, %s1693_s20  ;;  %534 = vrot.lane.b32.xlu0 %v2049_v11, %s1693_s20  ;;  %v2167_v28 = vmul.f32 %v2047_v10, %v2047_v10  ;;  %v2171_v29 = vmul.f32 %v2049_v11, %v2049_v11 }
 0x121   : > { %v2239_v8 = vmul.f32 %v2037_v6, %v1965_v38  ;;  %v2243_v9 = vmul.f32 %v2039_v7, %v1967_v39 }
 0x123   : > { %v2057_v12 = vld [vmem:[#allocation3 + $0x28] sm:$0xff]  ;;  %v2059_v13 = vld [vmem:[#allocation3 + $0x20] sm:$0xff]  ;;  %2977 = vst [vmem:[#allocation14_spill] sm:$0xff] %v2239_v8  ;;  %2978 = vst [vmem:[#allocation15_spill] sm:$0xff] %v2243_v9 }
 0x124   : > { %540 = vrot.lane.b32.xlu1 %v2057_v12, %s1693_s20  ;;  %538 = vrot.lane.b32.xlu0 %v2059_v13, %s1693_s20  ;;  %v2179_v32 = vmul.f32 %v2057_v12, %v2057_v12  ;;  %v2183_v33 = vmul.f32 %v2059_v13, %v2059_v13 }
 0x127   : > { %v2065_v14 = vld [vmem:[#allocation3 + $0x38] sm:$0xff]  ;;  %v2067_v15 = vld [vmem:[#allocation3 + $0x30] sm:$0xff] }
 0x128   : > { %544 = vrot.lane.b32.xlu1 %v2065_v14, %s1693_s20  ;;  %542 = vrot.lane.b32.xlu0 %v2067_v15, %s1693_s20  ;;  %v2191_v36 = vmul.f32 %v2065_v14, %v2065_v14  ;;  %v2195_v37 = vmul.f32 %v2067_v15, %v2067_v15 }
 0x12c   : > { %564 = vrot.lane.b32.xlu1 %v2037_v6, %s1695_s17  ;;  %562 = vrot.lane.b32.xlu0 %v2039_v7, %s1695_s17 }
 0x130   : > { %568 = vrot.lane.b32.xlu1 %v2047_v10, %s1695_s17  ;;  %566 = vrot.lane.b32.xlu0 %v2049_v11, %s1695_s17 }
 0x134   : > { %572 = vrot.lane.b32.xlu1 %v2057_v12, %s1695_s17  ;;  %570 = vrot.lane.b32.xlu0 %v2059_v13, %s1695_s17 }
 0x138   : > { %576 = vrot.lane.b32.xlu1 %v2065_v14, %s1695_s17  ;;  %574 = vrot.lane.b32.xlu0 %v2067_v15, %s1695_s17 }
 0x13c   : > { %612 = vrot.lane.b32.xlu1 %v2091_v16, %s1693_s20  ;;  %610 = vrot.lane.b32.xlu0 %v2095_v17, %s1693_s20 }
 0x140   : > { %616 = vrot.lane.b32.xlu1 %v2103_v18, %s1693_s20  ;;  %614 = vrot.lane.b32.xlu0 %v2107_v19, %s1693_s20 }
 0x144   : > { %620 = vrot.lane.b32.xlu1 %v2115_v20, %s1693_s20  ;;  %618 = vrot.lane.b32.xlu0 %v2119_v21, %s1693_s20 }
 0x148   : > { %624 = vrot.lane.b32.xlu1 %v2127_v22, %s1693_s20  ;;  %622 = vrot.lane.b32.xlu0 %v2131_v23, %s1693_s20 }
 0x14c   : > { %644 = vrot.lane.b32.xlu1 %v2091_v16, %s1695_s17  ;;  %642 = vrot.lane.b32.xlu0 %v2095_v17, %s1695_s17 }
 0x150   : > { %648 = vrot.lane.b32.xlu1 %v2103_v18, %s1695_s17  ;;  %646 = vrot.lane.b32.xlu0 %v2107_v19, %s1695_s17 }
 0x154   : > { %652 = vrot.lane.b32.xlu1 %v2115_v20, %s1695_s17  ;;  %650 = vrot.lane.b32.xlu0 %v2119_v21, %s1695_s17 }
 0x158   : > { %656 = vrot.lane.b32.xlu1 %v2127_v22, %s1695_s17  ;;  %654 = vrot.lane.b32.xlu0 %v2131_v23, %s1695_s17 }
 0x15c   : > { %692 = vrot.lane.b32.xlu1 %v2155_v24, %s1693_s20  ;;  %690 = vrot.lane.b32.xlu0 %v2159_v25, %s1693_s20 }
 0x15e   : > { %v461_v26 = vpop.permute.xlu1 %460  ;;  %v459_v27 = vpop.permute.xlu0 %458 }
 0x15f   : > { %v483_v44 = vadd.f32 %v461_v26, %v1965_v38  ;;  %v482_v45 = vadd.f32 %v459_v27, %v1967_v39  ;;  %v2255_v38 = vmul.f32 %v2047_v10, %v1975_v42  ;;  %v2259_v39 = vmul.f32 %v2049_v11, %v1977_v43 }
 0x160   : > { %696 = vrot.lane.b32.xlu1 %v2167_v28, %s1693_s20  ;;  %694 = vrot.lane.b32.xlu0 %v2171_v29, %s1693_s20 }
 0x161   : > { %2979 = vst [vmem:[#allocation16_spill] sm:$0xff] %v2255_v38  ;;  %2980 = vst [vmem:[#allocation17_spill] sm:$0xff] %v2259_v39 }
 0x162   : > { %v465_v30 = vpop.permute.xlu1 %464  ;;  %v463_v31 = vpop.permute.xlu0 %462 }
 0x163   : > { %v485_v54 = vadd.f32 %v465_v30, %v1975_v42  ;;  %v484_v55 = vadd.f32 %v463_v31, %v1977_v43  ;;  %v2267_v30 = vmul.f32 %v2057_v12, %v1985_v46  ;;  %v2271_v31 = vmul.f32 %v2059_v13, %v1987_v47 }
 0x164   : > { %700 = vrot.lane.b32.xlu1 %v2179_v32, %s1693_s20  ;;  %698 = vrot.lane.b32.xlu0 %v2183_v33, %s1693_s20  ;;  %v2279_v42 = vmul.f32 %v2065_v14, %v1995_v50  ;;  %v2283_v43 = vmul.f32 %v2067_v15, %v1997_v51 }
 0x165   : > { %2981 = vst [vmem:[#allocation18_spill] sm:$0xff] %v2267_v30  ;;  %2982 = vst [vmem:[#allocation19_spill] sm:$0xff] %v2271_v31 }
 0x166   : > { %v469_v34 = vpop.permute.xlu1 %468  ;;  %v467_v35 = vpop.permute.xlu0 %466  ;;  %2983 = vst [vmem:[#allocation20_spill] sm:$0xff] %v2279_v42  ;;  %2984 = vst [vmem:[#allocation21_spill] sm:$0xff] %v2283_v43 }
 0x167   : > { %v487_v60 = vadd.f32 %v469_v34, %v1985_v46  ;;  %v486_v61 = vadd.f32 %v467_v35, %v1987_v47 }
 0x168   : > { %704 = vrot.lane.b32.xlu1 %v2191_v36, %s1693_s20  ;;  %702 = vrot.lane.b32.xlu0 %v2195_v37, %s1693_s20 }
 0x16a   : > { %v473_v40 = vpop.permute.xlu1 %472  ;;  %v471_v41 = vpop.permute.xlu0 %470 }
 0x16b   : > { %v489_v2 = vadd.f32 %v473_v40, %v1995_v50  ;;  %v488_v3 = vadd.f32 %v471_v41, %v1997_v51 }
 0x16c   : > { %724 = vrot.lane.b32.xlu1 %v2155_v24, %s1695_s17  ;;  %722 = vrot.lane.b32.xlu0 %v2159_v25, %s1695_s17 }
 0x16e   : > { %v493_v48 = vpop.permute.xlu1 %492  ;;  %v491_v49 = vpop.permute.xlu0 %490 }
 0x16f   : > { %v515_v52 = vadd.f32 %v493_v48, %v483_v44  ;;  %v514_v53 = vadd.f32 %v491_v49, %v482_v45 }
 0x170   : > { %728 = vrot.lane.b32.xlu1 %v2167_v28, %s1695_s17  ;;  %726 = vrot.lane.b32.xlu0 %v2171_v29, %s1695_s17 }
 0x171   : > { %836 = vst.msk [vmem:[#allocation4 + $0x9] sm:$0xff] %vm834_vm3, %v515_v52  ;;  %835 = vst.msk [vmem:[#allocation4 + $0x1] sm:$0xff] %vm834_vm3, %v514_v53 }
 0x172   : > { %849 = vst.msk [vmem:[#allocation4 + $0xb] sm:$0x40] %vm848_vm4, %v515_v52  ;;  %v497_v56 = vpop.permute.xlu1 %496  ;;  %v495_v57 = vpop.permute.xlu0 %494 }
 0x173   : > { %844 = vst.msk [vmem:[#allocation4 - $0x1] sm:$0x2] %vm843_vm5, %v514_v53  ;;  %v517_v58 = vadd.f32 %v497_v56, %v485_v54  ;;  %v516_v59 = vadd.f32 %v495_v57, %v484_v55 }
 0x174   : > { %732 = vrot.lane.b32.xlu1 %v2179_v32, %s1695_s17  ;;  %730 = vrot.lane.b32.xlu0 %v2183_v33, %s1695_s17 }
 0x175   : > { %838 = vst.msk [vmem:[#allocation4 + $0x21] sm:$0xff] %vm834_vm3, %v517_v58  ;;  %837 = vst.msk [vmem:[#allocation4 + $0x19] sm:$0xff] %vm834_vm3, %v516_v59 }
 0x176   : > { %850 = vst.msk [vmem:[#allocation4 + $0x23] sm:$0x40] %vm848_vm4, %v517_v58  ;;  %v501_v62 = vpop.permute.xlu1 %500  ;;  %v499_v63 = vpop.permute.xlu0 %498 }
 0x177   : > { %845 = vst.msk [vmem:[#allocation4 + $0x17] sm:$0x2] %vm843_vm5, %v516_v59  ;;  %v519_v0 = vadd.f32 %v501_v62, %v487_v60  ;;  %v518_v1 = vadd.f32 %v499_v63, %v486_v61 }
 0x178   : > { %736 = vrot.lane.b32.xlu1 %v2191_v36, %s1695_s17  ;;  %734 = vrot.lane.b32.xlu0 %v2195_v37, %s1695_s17  ;;  %v2307_v52 = vld [vmem:[#allocation4 + $0x9] sm:$0xff]  ;;  %v2311_v54 = vld [vmem:[#allocation4 + $0x1] sm:$0xff] }
 0x179   : > { %840 = vst.msk [vmem:[#allocation4 + $0x39] sm:$0xff] %vm834_vm3, %v519_v0  ;;  %839 = vst.msk [vmem:[#allocation4 + $0x31] sm:$0xff] %vm834_vm3, %v518_v1  ;;  %v2309_v53 = vld [vmem:[#allocation4 + $0x8] sm:$0xff] }
 0x17a   : > { %851 = vst.msk [vmem:[#allocation4 + $0x3b] sm:$0x40] %vm848_vm4, %v519_v0  ;;  %v505_v4 = vpop.permute.xlu1 %504  ;;  %v503_v5 = vpop.permute.xlu0 %502  ;;  %v2313_v57 = vld [vmem:[#allocation4 + $0x2] sm:$0xff]  ;;  %v2315_v58 = vld [vmem:[#allocation4 + $0xa] sm:$0xff] }
 0x17b   : > { %846 = vst.msk [vmem:[#allocation4 + $0x2f] sm:$0x2] %vm843_vm5, %v518_v1  ;;  %v521_v26 = vadd.f32 %v505_v4, %v489_v2  ;;  %v520_v27 = vadd.f32 %v503_v5, %v488_v3  ;;  %v2317_v59 = vld [vmem:[#allocation4] sm:$0xff] }
 0x17c   : > { %772 = vrot.lane.b32.xlu1 %v2239_v8, %s1693_s20  ;;  %770 = vrot.lane.b32.xlu0 %v2243_v9, %s1693_s20  ;;  %v2325_v62 = vld [vmem:[#allocation4 + $0x21] sm:$0xff]  ;;  %v2329_v0 = vld [vmem:[#allocation4 + $0x19] sm:$0xff] }
 0x17d   : > { %842 = vst.msk [vmem:[#allocation4 + $0x51] sm:$0xff] %vm834_vm3, %v521_v26  ;;  %841 = vst.msk [vmem:[#allocation4 + $0x49] sm:$0xff] %vm834_vm3, %v520_v27  ;;  %v2327_v63 = vld [vmem:[#allocation4 + $0x20] sm:$0xff] }
 0x17e   : > { %852 = vst.msk [vmem:[#allocation4 + $0x53] sm:$0x40] %vm848_vm4, %v521_v26  ;;  %v2331_v2 = vld [vmem:[#allocation4 + $0x1a] sm:$0xff] }
 0x17f   : > { %847 = vst.msk [vmem:[#allocation4 + $0x47] sm:$0x2] %vm843_vm5, %v520_v27  ;;  %v2335_v3 = vld [vmem:[#allocation4 + $0x18] sm:$0xff] }
 0x180   : > { %776 = vrot.lane.b32.xlu1 %v2255_v38, %s1693_s20  ;;  %774 = vrot.lane.b32.xlu0 %v2259_v39, %s1693_s20 }
 0x184   : > { %780 = vrot.lane.b32.xlu1 %v2267_v30, %s1693_s20  ;;  %778 = vrot.lane.b32.xlu0 %v2271_v31, %s1693_s20 }
 0x188   : > { %784 = vrot.lane.b32.xlu1 %v2279_v42, %s1693_s20  ;;  %782 = vrot.lane.b32.xlu0 %v2283_v43, %s1693_s20 }
 0x18c   : > { %804 = vrot.lane.b32.xlu1 %v2239_v8, %s1695_s17  ;;  %802 = vrot.lane.b32.xlu0 %v2243_v9, %s1695_s17 }
 0x18e   : > { %v533_v46 = vpop.permute.xlu1 %532  ;;  %v531_v47 = vpop.permute.xlu0 %530 }
 0x18f   : > { %v555_v44 = vadd.f32 %v533_v46, %v2037_v6  ;;  %v554_v45 = vadd.f32 %v531_v47, %v2039_v7  ;;  %v2343_v46 = vld [vmem:[#allocation4 + $0x39] sm:$0xff] }
 0x190   : > { %808 = vrot.lane.b32.xlu1 %v2255_v38, %s1695_s17  ;;  %806 = vrot.lane.b32.xlu0 %v2259_v39, %s1695_s17  ;;  %v2345_v47 = vld [vmem:[#allocation4 + $0x38] sm:$0xff] }
 0x192   : > { %v537_v50 = vpop.permute.xlu1 %536  ;;  %v535_v51 = vpop.permute.xlu0 %534 }
 0x193   : > { %v557_v6 = vadd.f32 %v537_v50, %v2047_v10  ;;  %v556_v7 = vadd.f32 %v535_v51, %v2049_v11  ;;  %v2333_v11 = vld [vmem:[#allocation4 + $0x22] sm:$0xff]  ;;  %v2347_v50 = vld [vmem:[#allocation4 + $0x31] sm:$0xff] }
 0x194   : > { %812 = vrot.lane.b32.xlu1 %v2267_v30, %s1695_s17  ;;  %810 = vrot.lane.b32.xlu0 %v2271_v31, %s1695_s17 }
 0x196   : > { %v541_v34 = vpop.permute.xlu1 %540  ;;  %v539_v35 = vpop.permute.xlu0 %538 }
 0x197   : > { %v559_v4 = vadd.f32 %v541_v34, %v2057_v12  ;;  %v558_v5 = vadd.f32 %v539_v35, %v2059_v13  ;;  %v2349_v34 = vld [vmem:[#allocation4 + $0x32] sm:$0xff]  ;;  %v2351_v13 = vld [vmem:[#allocation4 + $0x3a] sm:$0xff] }
 0x198   : > { %816 = vrot.lane.b32.xlu1 %v2279_v42, %s1695_s17  ;;  %814 = vrot.lane.b32.xlu0 %v2283_v43, %s1695_s17  ;;  %v2353_v35 = vld [vmem:[#allocation4 + $0x30] sm:$0xff] }
 0x19a   : > { %v545_v40 = vpop.permute.xlu1 %544  ;;  %v543_v41 = vpop.permute.xlu0 %542 }
 0x19e   : > { %v565_v48 = vpop.permute.xlu1 %564  ;;  %v563_v49 = vpop.permute.xlu0 %562 }
 0x19f   : > { %v587_v55 = vadd.f32 %v565_v48, %v555_v44  ;;  %v586_v56 = vadd.f32 %v563_v49, %v554_v45  ;;  %v561_v44 = vadd.f32 %v545_v40, %v2065_v14  ;;  %v560_v45 = vadd.f32 %v543_v41, %v2067_v15  ;;  %v2367_v40 = vld [vmem:[#allocation4 + $0x4a] sm:$0xff]  ;;  %v2369_v15 = vld [vmem:[#allocation4 + $0x52] sm:$0xff] }
 0x1a0   : > { %v2371_v41 = vld [vmem:[#allocation4 + $0x48] sm:$0xff] }
 0x1a1   : > { %902 = vst.msk [vmem:[#allocation4 + $0x9] sm:$0xff] %vm834_vm3, %v587_v55  ;;  %901 = vst.msk [vmem:[#allocation4 + $0x1] sm:$0xff] %vm834_vm3, %v586_v56 }
 0x1a2   : > { %913 = vst.msk [vmem:[#allocation4 + $0xb] sm:$0x40] %vm848_vm4, %v587_v55  ;;  %v569_v60 = vpop.permute.xlu1 %568  ;;  %v567_v61 = vpop.permute.xlu0 %566  ;;  %v2361_v55 = vld [vmem:[#allocation4 + $0x51] sm:$0xff] }
 0x1a3   : > { %909 = vst.msk [vmem:[#allocation4 - $0x1] sm:$0x2] %vm843_vm5, %v586_v56  ;;  %v589_v1 = vadd.f32 %v569_v60, %v557_v6  ;;  %v588_v10 = vadd.f32 %v567_v61, %v556_v7  ;;  %v2363_v56 = vld [vmem:[#allocation4 + $0x50] sm:$0xff] }
 0x1a4   : > { %v2365_v6 = vld [vmem:[#allocation4 + $0x49] sm:$0xff] }
 0x1a5   : > { %904 = vst.msk [vmem:[#allocation4 + $0x21] sm:$0xff] %vm834_vm3, %v589_v1  ;;  %903 = vst.msk [vmem:[#allocation4 + $0x19] sm:$0xff] %vm834_vm3, %v588_v10 }
 0x1a6   : > { %914 = vst.msk [vmem:[#allocation4 + $0x23] sm:$0x40] %vm848_vm4, %v589_v1  ;;  %v573_v26 = vpop.permute.xlu1 %572  ;;  %v571_v27 = vpop.permute.xlu0 %570 }
 0x1a7   : > { %910 = vst.msk [vmem:[#allocation4 + $0x17] sm:$0x2] %vm843_vm5, %v588_v10  ;;  %v591_v51 = vadd.f32 %v573_v26, %v559_v4  ;;  %v590_v12 = vadd.f32 %v571_v27, %v558_v5 }
 0x1a8   : > { %v2387_v31 = vld [vmem:[#allocation4 + $0x1] sm:$0xff] }
 0x1a9   : > { %906 = vst.msk [vmem:[#allocation4 + $0x39] sm:$0xff] %vm834_vm3, %v591_v51  ;;  %905 = vst.msk [vmem:[#allocation4 + $0x31] sm:$0xff] %vm834_vm3, %v590_v12  ;;  %v2389_v30 = vld [vmem:[#allocation4 + $0x2] sm:$0xff] }
 0x1aa   : > { %915 = vst.msk [vmem:[#allocation4 + $0x3b] sm:$0x40] %vm848_vm4, %v591_v51  ;;  %v577_v48 = vpop.permute.xlu1 %576  ;;  %v575_v49 = vpop.permute.xlu0 %574  ;;  %v2385_v42 = vld [vmem:[#allocation4] sm:$0xff] }
 0x1ab   : > { %911 = vst.msk [vmem:[#allocation4 + $0x2f] sm:$0x2] %vm843_vm5, %v590_v12  ;;  %v593_v7 = vadd.f32 %v577_v48, %v561_v44  ;;  %v592_v14 = vadd.f32 %v575_v49, %v560_v45  ;;  %v2379_v49 = vld [vmem:[#allocation4 + $0x8] sm:$0xff] }
 0x1ad   : > { %908 = vst.msk [vmem:[#allocation4 + $0x51] sm:$0xff] %vm834_vm3, %v593_v7  ;;  %907 = vst.msk [vmem:[#allocation4 + $0x49] sm:$0xff] %vm834_vm3, %v592_v14 }
 0x1ae   : > { %916 = vst.msk [vmem:[#allocation4 + $0x53] sm:$0x40] %vm848_vm4, %v593_v7  ;;  %v613_v60 = vpop.permute.xlu1 %612  ;;  %v611_v61 = vpop.permute.xlu0 %610  ;;  %v2381_v7 = vld [vmem:[#allocation4 + $0x9] sm:$0xff] }
 0x1af   : > { %912 = vst.msk [vmem:[#allocation4 + $0x47] sm:$0x2] %vm843_vm5, %v592_v14  ;;  %v635_v51 = vadd.f32 %v613_v60, %v2091_v16  ;;  %v634_v12 = vadd.f32 %v611_v61, %v2095_v17  ;;  %v2383_v14 = vld [vmem:[#allocation4 + $0xa] sm:$0xff] }
 0x1b0   : > { %v2417_v39 = vld [vmem:[#allocation4 + $0x39] sm:$0xff] }
 0x1b1   : > { %v2419_v38 = vld [vmem:[#allocation4 + $0x3a] sm:$0xff] }
 0x1b2   : > { %v617_v1 = vpop.permute.xlu1 %616  ;;  %v615_v10 = vpop.permute.xlu0 %614 }
 0x1b3   : > { %v637_v16 = vadd.f32 %v617_v1, %v2103_v18  ;;  %v636_v17 = vadd.f32 %v615_v10, %v2107_v19  ;;  %v2403_v1 = vld [vmem:[#allocation4 + $0x18] sm:$0xff] }
 0x1b4   : > { %v2405_v19 = vld [vmem:[#allocation4 + $0x19] sm:$0xff]  ;;  %v2435_v9 = vld [vmem:[#allocation4 + $0x51] sm:$0xff] }
 0x1b5   : > { %v2407_v10 = vld [vmem:[#allocation4 + $0x1a] sm:$0xff]  ;;  %v2437_v8 = vld [vmem:[#allocation4 + $0x52] sm:$0xff] }
 0x1b6   : > { %v621_v4 = vpop.permute.xlu1 %620  ;;  %v619_v5 = vpop.permute.xlu0 %618 }
 0x1ba   : > { %v625_v26 = vpop.permute.xlu1 %624  ;;  %v623_v27 = vpop.permute.xlu0 %622 }
 0x1be   : > { %v645_v44 = vpop.permute.xlu1 %644  ;;  %v643_v45 = vpop.permute.xlu0 %642 }
 0x1bf   : > { %v667_v48 = vadd.f32 %v645_v44, %v635_v51  ;;  %v666_v43 = vadd.f32 %v643_v45, %v634_v12  ;;  %v2397_v12 = vld [vmem:[#allocation4 + $0x20] sm:$0xff] }
 0x1c0   : > { %v2399_v44 = vld [vmem:[#allocation4 + $0x21] sm:$0xff] }
 0x1c1   : > { %977 = vst.msk [vmem:[#allocation4 + $0xb] sm:$0x40] %vm848_vm4, %v667_v48  ;;  %v2401_v45 = vld [vmem:[#allocation4 + $0x22] sm:$0xff] }
 0x1c2   : > { %965 = vst.msk [vmem:[#allocation4 + $0x1] sm:$0xff] %vm834_vm3, %v666_v43  ;;  %966 = vst.msk [vmem:[#allocation4 + $0x9] sm:$0xff] %vm834_vm3, %v667_v48  ;;  %v649_v60 = vpop.permute.xlu1 %648  ;;  %v647_v61 = vpop.permute.xlu0 %646  ;;  %v638_v48 = vadd.f32 %v619_v5, %v2119_v21  ;;  %v2423_v21 = vld [vmem:[#allocation4 + $0x31] sm:$0xff] }
 0x1c3   : > { %973 = vst.msk [vmem:[#allocation4 - $0x1] sm:$0x2] %vm843_vm5, %v666_v43  ;;  %v669_v51 = vadd.f32 %v649_v60, %v637_v16  ;;  %v668_v18 = vadd.f32 %v647_v61, %v636_v17  ;;  %v639_v43 = vadd.f32 %v621_v4, %v2115_v20  ;;  %v2415_v61 = vld [vmem:[#allocation4 + $0x38] sm:$0xff]  ;;  %v2421_v4 = vld [vmem:[#allocation4 + $0x30] sm:$0xff] }
 0x1c4   : > { %v2425_v5 = vld [vmem:[#allocation4 + $0x32] sm:$0xff] }
 0x1c5   : > { %978 = vst.msk [vmem:[#allocation4 + $0x23] sm:$0x40] %vm848_vm4, %v669_v51 }
 0x1c6   : > { %967 = vst.msk [vmem:[#allocation4 + $0x19] sm:$0xff] %vm834_vm3, %v668_v18  ;;  %968 = vst.msk [vmem:[#allocation4 + $0x21] sm:$0xff] %vm834_vm3, %v669_v51  ;;  %v653_v16 = vpop.permute.xlu1 %652  ;;  %v651_v17 = vpop.permute.xlu0 %650  ;;  %v640_v51 = vadd.f32 %v623_v27, %v2131_v23  ;;  %v2441_v23 = vld [vmem:[#allocation4 + $0x49] sm:$0xff] }
 0x1c7   : > { %974 = vst.msk [vmem:[#allocation4 + $0x17] sm:$0x2] %vm843_vm5, %v668_v18  ;;  %v671_v60 = vadd.f32 %v653_v16, %v639_v43  ;;  %v670_v20 = vadd.f32 %v651_v17, %v638_v48  ;;  %v641_v18 = vadd.f32 %v625_v26, %v2127_v22  ;;  %v2433_v17 = vld [vmem:[#allocation4 + $0x50] sm:$0xff]  ;;  %v2439_v26 = vld [vmem:[#allocation4 + $0x48] sm:$0xff] }
 0x1c8   : > { %v2443_v27 = vld [vmem:[#allocation4 + $0x4a] sm:$0xff] }
 0x1c9   : > { %979 = vst.msk [vmem:[#allocation4 + $0x3b] sm:$0x40] %vm848_vm4, %v671_v60 }
 0x1ca   : > { %969 = vst.msk [vmem:[#allocation4 + $0x31] sm:$0xff] %vm834_vm3, %v670_v20  ;;  %970 = vst.msk [vmem:[#allocation4 + $0x39] sm:$0xff] %vm834_vm3, %v671_v60  ;;  %v657_v43 = vpop.permute.xlu1 %656  ;;  %v655_v48 = vpop.permute.xlu0 %654  ;;  %v870_v60 = vadd.f32 %v2307_v52, %v2309_v53 }
 0x1cb   : > { %975 = vst.msk [vmem:[#allocation4 + $0x2f] sm:$0x2] %vm843_vm5, %v670_v20  ;;  %v673_v16 = vadd.f32 %v657_v43, %v641_v18  ;;  %v672_v22 = vadd.f32 %v655_v48, %v640_v51  ;;  %v869_v20 = vadd.f32 %v2311_v54, %v2317_v59  ;;  %v872_v18 = vadd.f32 %v2325_v62, %v2327_v63 }
 0x1cc   : > { %v871_v48 = vadd.f32 %v2329_v0, %v2335_v3  ;;  %v874_v54 = vadd.f32 %v2343_v46, %v2345_v47  ;;  %v886_v53 = vadd.f32 %v2315_v58, %v870_v60  ;;  %v873_v63 = vadd.f32 %v2347_v50, %v2353_v35 }
 0x1cd   : > { %980 = vst.msk [vmem:[#allocation4 + $0x53] sm:$0x40] %vm848_vm4, %v673_v16  ;;  %v885_v52 = vadd.f32 %v2313_v57, %v869_v20  ;;  %v888_v59 = vadd.f32 %v2333_v11, %v872_v18  ;;  %v933_v0 = vadd.f32 %v2387_v31, %v2385_v42  ;;  %v876_v57 = vadd.f32 %v2361_v55, %v2363_v56 }
 0x1ce   : > { %971 = vst.msk [vmem:[#allocation4 + $0x49] sm:$0xff] %vm834_vm3, %v672_v22  ;;  %972 = vst.msk [vmem:[#allocation4 + $0x51] sm:$0xff] %vm834_vm3, %v673_v16  ;;  %v693_v51 = vpop.permute.xlu1 %692  ;;  %v691_v43 = vpop.permute.xlu0 %690  ;;  %v887_v62 = vadd.f32 %v2331_v2, %v871_v48  ;;  %v890_v3 = vadd.f32 %v2351_v13, %v874_v54  ;;  %v2476_v11 = vmul.f32 0.11111111, %v886_v53  ;;  %v875_v46 = vadd.f32 %v2365_v6, %v2371_v41 }
 0x1cf   : > { %976 = vst.msk [vmem:[#allocation4 + $0x47] sm:$0x2] %vm843_vm5, %v672_v22  ;;  %v2474_v58 = vmul.f32 0.11111111, %v885_v52  ;;  %v934_v2 = vadd.f32 %v2381_v7, %v2379_v49  ;;  %v2482_v47 = vmul.f32 0.11111111, %v888_v59  ;;  %v889_v13 = vadd.f32 %v2349_v34, %v873_v63 }
 0x1d0   : > { %v2488_v42 = vmul.f32 0.11111111, %v887_v62  ;;  %v949_v35 = vadd.f32 %v2389_v30, %v933_v0  ;;  %v935_v55 = vadd.f32 %v2405_v19, %v2403_v1  ;;  %v2494_v56 = vmul.f32 0.11111111, %v890_v3 }
 0x1d1   : > { %v892_v6 = vadd.f32 %v2369_v15, %v876_v57  ;;  %v2499_v41 = vmul.f32 %v2474_v58, %v2474_v58  ;;  %v1205_v49 = vmul.f32 2.0, %v2474_v58  ;;  %v1206_v7 = vmul.f32 2.0, %v2476_v11 }
 0x1d2   : > { %v2462_v22 = vpop.permute.xlu1 %696  ;;  %v2464_v16 = vpop.permute.xlu0 %694  ;;  %v2505_v34 = vmul.f32 %v2476_v11, %v2476_v11  ;;  %v891_v30 = vadd.f32 %v2367_v40, %v875_v46  ;;  %v950_v1 = vadd.f32 %v2383_v14, %v934_v2  ;;  %v936_v19 = vadd.f32 %v2399_v44, %v2397_v12 }
 0x1d3   : > { %v2512_v15 = vmul.f32 2.0, %v2482_v47  ;;  %v2520_v18 = vmul.f32 %v2488_v42, %v2488_v42  ;;  %v2523_v48 = vmul.f32 2.0, %v2488_v42  ;;  %v2525_v40 = vmul.f32 0.11111111, %v889_v13 }
 0x1d4   : > { %v2529_v14 = vmul.f32 %v2482_v47, %v2482_v47  ;;  %v957_v12 = vmul.f32 0.11111111, %v949_v35  ;;  %v951_v44 = vadd.f32 %v2407_v10, %v935_v55  ;;  %v2533_v54 = vmul.f32 2.0, %v2494_v56  ;;  %v2570_v35 = vld [vmem:[#allocation4] sm:$0xff] }
 0x1d5   : > { %2985 = vst [vmem:[#allocation22_spill] sm:$0xff] %v2520_v18  ;;  %v2535_v52 = vmul.f32 0.11111111, %v892_v6  ;;  %v938_v53 = vadd.f32 %v2417_v39, %v2415_v61  ;;  %v937_v59 = vadd.f32 %v2423_v21, %v2421_v4  ;;  %v715_v62 = vadd.f32 %v693_v51, %v2155_v24  ;;  %v2559_v4 = vld [vmem:[#allocation4 + $0x9] sm:$0xff]  ;;  %v2572_v55 = vld [vmem:[#allocation4 + $0x1] sm:$0xff] }
 0x1d6   : > { %v2484_v50 = vpop.permute.xlu1 %700  ;;  %v2486_v31 = vpop.permute.xlu0 %698  ;;  %v714_v63 = vadd.f32 %v691_v43, %v2159_v25  ;;  %v2543_v0 = vmul.f32 0.11111111, %v891_v30  ;;  %v958_v3 = vmul.f32 0.11111111, %v950_v1  ;;  %v952_v10 = vadd.f32 %v2401_v45, %v936_v19  ;;  %v2557_v25 = vld [vmem:[#allocation4 + $0x8] sm:$0xff] }
 0x1d7   : > { %v2548_v2 = vmul.f32 %v2494_v56, %v2494_v56  ;;  %v2552_v39 = vmul.f32 %v2525_v40, %v2525_v40  ;;  %v2555_v61 = vmul.f32 2.0, %v2525_v40  ;;  %v2561_v21 = vld [vmem:[#allocation4 + $0xa] sm:$0xff]  ;;  %v2563_v51 = vmul.f32 %v957_v12, %v957_v12  ;;  %v2574_v6 = vld [vmem:[#allocation4 + $0x2] sm:$0xff] }
 0x1d8   : > { %v2565_v43 = vmul.f32 0.11111111, %v951_v44  ;;  %v2568_v13 = vmul.f32 2.0, %v2535_v52  ;;  %v2578_v30 = vmul.f32 %v2535_v52, %v2535_v52  ;;  %v954_v1 = vadd.f32 %v2419_v38, %v938_v53 }
 0x1d9   : > { %v953_v19 = vadd.f32 %v2425_v5, %v937_v59  ;;  %v717_v44 = vadd.f32 %v2462_v22, %v2167_v28  ;;  %v2595_v38 = vmul.f32 2.0, %v2543_v0  ;;  %v1214_v5 = vmul.f32 %v1206_v7, %v958_v3 }
 0x1da   : > { %v2514_v20 = vpop.permute.xlu1 %704  ;;  %v2516_v60 = vpop.permute.xlu0 %702  ;;  %2986 = vst [vmem:[#allocation23_spill] sm:$0xff] %v2578_v30  ;;  %v960_v28 = vmul.f32 0.11111111, %v952_v10  ;;  %v2606_v30 = vmul.f32 %v958_v3, %v2476_v11  ;;  %v1253_v7 = vadd.f32 %v2563_v51, %v2499_v41  ;;  %v2617_v10 = vld [vmem:[#allocation4 + $0x18] sm:$0xff] }
 0x1db   : > { %2987 = vst [vmem:[#allocation24_spill] sm:$0xff] %v2595_v38  ;;  %v2609_v38 = vmul.f32 %v957_v12, %v2474_v58  ;;  %v2625_v11 = vmul.f32 0.11111111, %v953_v19  ;;  %v719_v58 = vadd.f32 %v2484_v50, %v2179_v32  ;;  %v1215_v19 = vmul.f32 %v2523_v48, %v2565_v43 }
 0x1dc   : > { %2988 = vst [vmem:[#allocation25_spill] sm:$0xff] %v2606_v30  ;;  %v939_v32 = vadd.f32 %v2441_v23, %v2439_v26  ;;  %v2646_v30 = vld [vmem:[#allocation4 + $0x38] sm:$0xff]  ;;  %v2654_v48 = vmul.f32 %v960_v28, %v960_v28 }
 0x1dd   : > { %2989 = vst [vmem:[#allocation26_spill] sm:$0xff] %v2609_v38 }
 0x1de   : > { %v725_v57 = vpop.permute.xlu1 %724  ;;  %v723_v46 = vpop.permute.xlu0 %722 }
 0x1df   : > { %v747_v24 = vadd.f32 %v725_v57, %v715_v62  ;;  %v746_v45 = vadd.f32 %v723_v46, %v714_v63  ;;  %v716_v62 = vadd.f32 %v2464_v16, %v2171_v29  ;;  %v2592_v63 = vmul.f32 %v2543_v0, %v2543_v0  ;;  %v2599_v57 = vld [vmem:[#allocation4 + $0x20] sm:$0xff] }
 0x1e0   : > { %v2597_v29 = vmul.f32 %v958_v3, %v958_v3  ;;  %v1213_v16 = vmul.f32 %v1205_v49, %v957_v12  ;;  %v2601_v46 = vld [vmem:[#allocation4 + $0x21] sm:$0xff]  ;;  %v2615_v49 = vmul.f32 %v2565_v43, %v2565_v43  ;;  %v718_v12 = vadd.f32 %v2486_v31, %v2183_v33 }
 0x1e1   : > { %1041 = vst.msk [vmem:[#allocation4 + $0xb] sm:$0x40] %vm848_vm4, %v747_v24  ;;  %v2635_v3 = vadd.f32 0.0001, %v1214_v5  ;;  %v2648_v5 = vld [vmem:[#allocation4 + $0x39] sm:$0xff] }
 0x1e2   : > { %1029 = vst.msk [vmem:[#allocation4 + $0x1] sm:$0xff] %vm834_vm3, %v746_v45  ;;  %1030 = vst.msk [vmem:[#allocation4 + $0x9] sm:$0xff] %vm834_vm3, %v747_v24  ;;  %v729_v22 = vpop.permute.xlu1 %728  ;;  %v727_v53 = vpop.permute.xlu0 %726  ;;  %v2603_v24 = vld [vmem:[#allocation4 + $0x22] sm:$0xff]  ;;  %v2642_v31 = vadd.f32 0.0001, %v1213_v16  ;;  %v1255_v26 = vadd.f32 %v2615_v49, %v2520_v18  ;;  %v1254_v23 = vadd.f32 %v2597_v29, %v2505_v34  ;;  %v2660_v16 = vld [vmem:[#allocation4 + $0x30] sm:$0xff] }
 0x1e3   : > { %1037 = vst.msk [vmem:[#allocation4 - $0x1] sm:$0x2] %vm843_vm5, %v746_v45  ;;  %v749_v59 = vadd.f32 %v729_v22, %v717_v44  ;;  %v748_v45 = vadd.f32 %v727_v53, %v716_v62  ;;  %2990 = vst [vmem:[#allocation27_spill] sm:$0xff] %v2615_v49  ;;  %v2619_v44 = vld [vmem:[#allocation4 + $0x19] sm:$0xff]  ;;  %v2623_v62 = vmul.f32 0.11111111, %v954_v1  ;;  %v1216_v1 = vmul.f32 %v2512_v15, %v960_v28 }
 0x1e4   : > { %v2621_v22 = vld [vmem:[#allocation4 + $0x1a] sm:$0xff]  ;;  %2991 = vst [vmem:[#allocation28_spill] sm:$0xff] %v2635_v3  ;;  %2992 = vst [vmem:[#allocation29_spill] sm:$0xff] %v2642_v31  ;;  %v940_v53 = vadd.f32 %v2435_v9, %v2433_v17  ;;  %v2652_v3 = vadd.f32 0.0001, %v1253_v7  ;;  %v2662_v9 = vld [vmem:[#allocation4 + $0x31] sm:$0xff]  ;;  %v2670_v7 = vmul.f32 %v2625_v11, %v2625_v11  ;;  %v2681_v31 = vmul.f32 %v960_v28, %v2482_v47 }
 0x1e5   : > { %1042 = vst.msk [vmem:[#allocation4 + $0x23] sm:$0x40] %vm848_vm4, %v749_v59  ;;  %v2664_v17 = vld [vmem:[#allocation4 + $0x32] sm:$0xff]  ;;  %v2683_v38 = vadd.f32 0.0001, %v1216_v1  ;;  %v2709_v18 = vld [vmem:[#allocation4 + $0x49] sm:$0xff] }
 0x1e6   : > { %1031 = vst.msk [vmem:[#allocation4 + $0x19] sm:$0xff] %vm834_vm3, %v748_v45  ;;  %1032 = vst.msk [vmem:[#allocation4 + $0x21] sm:$0xff] %vm834_vm3, %v749_v59  ;;  %v733_v50 = vpop.permute.xlu1 %732  ;;  %v731_v33 = vpop.permute.xlu0 %730  ;;  %v2650_v59 = vld [vmem:[#allocation4 + $0x3a] sm:$0xff]  ;;  %v2697_v28 = vld [vmem:[#allocation4 + $0x52] sm:$0xff] }
 0x1e7   : > { %1038 = vst.msk [vmem:[#allocation4 + $0x17] sm:$0x2] %vm843_vm5, %v748_v45  ;;  %v751_v45 = vadd.f32 %v733_v50, %v719_v58  ;;  %v750_v15 = vadd.f32 %v731_v33, %v718_v12  ;;  %2993 = vst [vmem:[#allocation30_spill] sm:$0xff] %v2652_v3  ;;  %v1218_v58 = vmul.f32 %v2533_v54, %v2623_v62  ;;  %v2685_v3 = vadd.f32 0.0001, %v1215_v19 }
 0x1e8   : > { %v721_v12 = vadd.f32 %v2514_v20, %v2191_v36  ;;  %v720_v50 = vadd.f32 %v2516_v60, %v2195_v37  ;;  %2994 = vst [vmem:[#allocation31_spill] sm:$0xff] %v2681_v31  ;;  %2995 = vst [vmem:[#allocation32_spill] sm:$0xff] %v2683_v38  ;;  %v955_v36 = vadd.f32 %v2443_v27, %v939_v32  ;;  %v2688_v20 = vld [vmem:[#allocation4 + $0x50] sm:$0xff]  ;;  %v2703_v32 = vadd.f32 0.0001, %v1255_v26  ;;  %v2707_v31 = vld [vmem:[#allocation4 + $0x48] sm:$0xff] }
 0x1e9   : > { %1043 = vst.msk [vmem:[#allocation4 + $0x3b] sm:$0x40] %vm848_vm4, %v751_v45  ;;  %v1053_v54 = vld [vmem:[#allocation4 + $0x1] sm:$0xff]  ;;  %2996 = vst [vmem:[#allocation33_spill] sm:$0xff] %v2685_v3  ;;  %v2690_v60 = vld [vmem:[#allocation4 + $0x51] sm:$0xff]  ;;  %v2701_v27 = vmul.f32 %v2565_v43, %v2488_v42  ;;  %v998_v3 = vadd.f32 %v2559_v4, %v2557_v25  ;;  %v1257_v42 = vadd.f32 %v2670_v7, %v2552_v39 }
 0x1ea   : > { %1033 = vst.msk [vmem:[#allocation4 + $0x31] sm:$0xff] %vm834_vm3, %v750_v15  ;;  %1034 = vst.msk [vmem:[#allocation4 + $0x39] sm:$0xff] %vm834_vm3, %v751_v45  ;;  %v1045_v33 = vld [vmem:[#allocation4] sm:$0xff]  ;;  %v737_v37 = vpop.permute.xlu1 %736  ;;  %v735_v49 = vpop.permute.xlu0 %734  ;;  %v2694_v45 = vmul.f32 %v2623_v62, %v2623_v62  ;;  %v1046_v19 = vld [vmem:[#allocation4 + $0x8] sm:$0xff]  ;;  %v997_v43 = vadd.f32 %v2572_v55, %v2570_v35  ;;  %v2725_v26 = vmul.f32 0.11111111, %v955_v36 }
 0x1eb   : > { %1039 = vst.msk [vmem:[#allocation4 + $0x2f] sm:$0x2] %vm843_vm5, %v750_v15  ;;  %v956_v15 = vadd.f32 %v2437_v8, %v940_v53  ;;  %v753_v47 = vadd.f32 %v737_v37, %v721_v12  ;;  %v752_v1 = vadd.f32 %v735_v49, %v720_v50  ;;  %v1054_v38 = vld [vmem:[#allocation4 + $0x9] sm:$0xff]  ;;  %2997 = vst [vmem:[#allocation34_spill] sm:$0xff] %v2701_v27  ;;  %v2713_v12 = vadd.f32 0.0001, %v1218_v58 }
 0x1ec   : > { %v2711_v8 = vld [vmem:[#allocation4 + $0x4a] sm:$0xff]  ;;  %v1061_v53 = vadd.f32 %v1053_v54, %v1045_v33  ;;  %v1217_v49 = vmul.f32 %v2555_v61, %v2625_v11  ;;  %v2727_v58 = vadd.f32 0.0001, %v1254_v23  ;;  %v1256_v61 = vadd.f32 %v2654_v48, %v2529_v14  ;;  %v1069_v36 = vld [vmem:[#allocation4 + $0x2] sm:$0xff] }
 0x1ed   : > { %2998 = vst [vmem:[#allocation35_spill] sm:$0xff] %v2713_v12  ;;  %1044 = vst.msk [vmem:[#allocation4 + $0x53] sm:$0x40] %vm848_vm4, %v753_v47  ;;  %v1055_v4 = vld [vmem:[#allocation4 + $0x19] sm:$0xff]  ;;  %v1062_v55 = vadd.f32 %v1054_v38, %v1046_v19  ;;  %v2737_v33 = vmul.f32 %v2623_v62, %v2494_v56  ;;  %v964_v54 = vmul.f32 0.11111111, %v956_v15  ;;  %v1000_v37 = vadd.f32 %v2601_v46, %v2599_v57 }
 0x1ee   : > { %1035 = vst.msk [vmem:[#allocation4 + $0x49] sm:$0xff] %vm834_vm3, %v752_v1  ;;  %1036 = vst.msk [vmem:[#allocation4 + $0x51] sm:$0xff] %vm834_vm3, %v753_v47  ;;  %v1047_v25 = vld [vmem:[#allocation4 + $0x18] sm:$0xff]  ;;  %v2731_v50 = vpop.permute.xlu1 %772  ;;  %v2733_v35 = vpop.permute.xlu0 %770  ;;  %v1258_v23 = vadd.f32 %v2694_v45, %v2548_v2  ;;  %v1048_v47 = vld [vmem:[#allocation4 + $0x20] sm:$0xff]  ;;  %v1014_v12 = vadd.f32 %v2561_v21, %v998_v3  ;;  %v999_v27 = vadd.f32 %v2619_v44, %v2617_v10  ;;  %v2750_v62 = vadd.f32 0.0001, %v1217_v49 }
 0x1ef   : > { %1040 = vst.msk [vmem:[#allocation4 + $0x47] sm:$0x2] %vm843_vm5, %v752_v1  ;;  %2999 = vst [vmem:[#allocation36_spill] sm:$0xff] %v2737_v33  ;;  %v1056_v1 = vld [vmem:[#allocation4 + $0x21] sm:$0xff]  ;;  %v1077_v38 = vadd.f32 %v1069_v36, %v1061_v53  ;;  %v1063_v19 = vadd.f32 %v1055_v4, %v1047_v25  ;;  %v2748_v56 = vmul.f32 %v2625_v11, %v2525_v40  ;;  %v2752_v57 = vadd.f32 0.0001, %v1257_v42 }
 0x1f0   : > { %3001 = vst [vmem:[#allocation38_spill] sm:$0xff] %v2750_v62  ;;  %v1013_v46 = vadd.f32 %v2574_v6, %v997_v43  ;;  %v1070_v15 = vld [vmem:[#allocation4 + $0xa] sm:$0xff]  ;;  %v2757_v33 = vmul.f32 %v2725_v26, %v2725_v26  ;;  %v2759_v21 = vadd.f32 0.0001, %v1256_v61  ;;  %v1064_v40 = vadd.f32 %v1056_v1, %v1048_v47  ;;  %v1071_v25 = vld [vmem:[#allocation4 + $0x1a] sm:$0xff] }
 0x1f1   : > { %3000 = vst [vmem:[#allocation37_spill] sm:$0xff] %v2748_v56  ;;  %3002 = vst [vmem:[#allocation39_spill] sm:$0xff] %v2752_v57  ;;  %v1078_v3 = vadd.f32 %v1070_v15, %v1062_v55  ;;  %v1057_v53 = vld [vmem:[#allocation4 + $0x31] sm:$0xff]  ;;  %v2765_v49 = vmul.f32 %v964_v54, %v964_v54  ;;  %v2768_v42 = vmul.f32 %v964_v54, %v2535_v52  ;;  %v2771_v43 = vadd.f32 0.0001, %v1258_v23  ;;  %v1058_v61 = vld [vmem:[#allocation4 + $0x39] sm:$0xff] }
 0x1f2   : > { %v2761_v10 = vpop.permute.xlu1 %776  ;;  %v2763_v44 = vpop.permute.xlu0 %774  ;;  %v1049_v11 = vld [vmem:[#allocation4 + $0x30] sm:$0xff]  ;;  %v1016_v6 = vadd.f32 %v2603_v24, %v1000_v37  ;;  %v1050_v4 = vld [vmem:[#allocation4 + $0x38] sm:$0xff]  ;;  %v1022_v36 = vmul.f32 0.11111111, %v1014_v12  ;;  %v1015_v62 = vadd.f32 %v2621_v22, %v999_v27  ;;  %v1085_v56 = vmul.f32 0.11111111, %v1077_v38 }
 0x1f3   : > { %3003 = vst [vmem:[#allocation40_spill] sm:$0xff] %v2768_v42  ;;  %3004 = vst [vmem:[#allocation41_spill] sm:$0xff] %v2771_v43  ;;  %v1079_v55 = vadd.f32 %v1071_v25, %v1063_v19  ;;  %v2775_v15 = vmul.f32 %v2568_v13, %v964_v54  ;;  %v2779_v52 = vmul.f32 %v2725_v26, %v2543_v0  ;;  %v1021_v24 = vmul.f32 0.11111111, %v1013_v46  ;;  %v1072_v37 = vld [vmem:[#allocation4 + $0x22] sm:$0xff]  ;;  %v1073_v57 = vld [vmem:[#allocation4 + $0x32] sm:$0xff] }
 0x1f4   : > { %v1065_v23 = vadd.f32 %v1057_v53, %v1049_v11  ;;  %v2783_v42 = vadd.f32 %v2757_v33, %v2592_v63  ;;  %v1086_v27 = vmul.f32 0.11111111, %v1078_v3  ;;  %v1080_v38 = vadd.f32 %v1072_v37, %v1064_v40 }
 0x1f5   : > { %v1052_v47 = vld [vmem:[#allocation4 + $0x50] sm:$0xff]  ;;  %3005 = vst [vmem:[#allocation42_spill] sm:$0xff] %v2775_v15  ;;  %3006 = vst [vmem:[#allocation43_spill] sm:$0xff] %v2779_v52  ;;  %v1066_v19 = vadd.f32 %v1058_v61, %v1050_v4  ;;  %v1024_v25 = vmul.f32 0.11111111, %v1016_v6  ;;  %v1002_v0 = vadd.f32 %v2648_v5, %v2646_v30  ;;  %v1001_v46 = vadd.f32 %v2662_v9, %v2660_v16  ;;  %v1074_v6 = vld [vmem:[#allocation4 + $0x3a] sm:$0xff] }
 0x1f6   : > { %v1060_v1 = vld [vmem:[#allocation4 + $0x51] sm:$0xff]  ;;  %v2785_v12 = vpop.permute.xlu1 %780  ;;  %v2787_v22 = vpop.permute.xlu0 %778  ;;  %v1051_v13 = vld [vmem:[#allocation4 + $0x48] sm:$0xff]  ;;  %v1166_v53 = vsub.f32 %v1022_v36, %v2505_v34  ;;  %v1023_v52 = vmul.f32 0.11111111, %v1015_v62  ;;  %v1181_v15 = vsub.f32 %v1085_v56, %v2563_v51  ;;  %v1087_v43 = vmul.f32 0.11111111, %v1079_v55 }
 0x1f7   : > { %v1059_v54 = vld [vmem:[#allocation4 + $0x49] sm:$0xff]  ;;  %v1068_v11 = vadd.f32 %v1060_v1, %v1052_v47  ;;  %v1165_v3 = vsub.f32 %v1021_v24, %v2499_v41  ;;  %v1004_v40 = vadd.f32 %v2690_v60, %v2688_v20  ;;  %v1081_v4 = vadd.f32 %v1073_v57, %v1065_v23  ;;  %v1076_v56 = vld [vmem:[#allocation4 + $0x52] sm:$0xff]  ;;  %v3007_v36 = vld [vmem:[#allocation22_spill] sm:$0xff] }
 0x1f8   : > { %v1067_v61 = vadd.f32 %v1059_v54, %v1051_v13  ;;  %v1003_v30 = vadd.f32 %v2709_v18, %v2707_v31  ;;  %v1182_v34 = vsub.f32 %v1086_v27, %v2597_v29  ;;  %v1088_v51 = vmul.f32 0.11111111, %v1080_v38  ;;  %v1075_v60 = vld [vmem:[#allocation4 + $0x4a] sm:$0xff]  ;;  %v3009_v29 = vld [vmem:[#allocation14_spill] sm:$0xff] }
 0x1f9   : > { %v1082_v9 = vadd.f32 %v1074_v6, %v1066_v19  ;;  %v1168_v41 = vsub.f32 %v1024_v25, %v2529_v14  ;;  %v1018_v62 = vadd.f32 %v2650_v59, %v1002_v0  ;;  %v1017_v20 = vadd.f32 %v2664_v17, %v1001_v46  ;;  %v3008_v31 = vld [vmem:[#allocation27_spill] sm:$0xff] }
 0x1fa   : > { %v2800_v5 = vpop.permute.xlu1 %784  ;;  %v2802_v16 = vpop.permute.xlu0 %782  ;;  %v1084_v57 = vadd.f32 %v1076_v56, %v1068_v11  ;;  %v1167_v55 = vsub.f32 %v1023_v52, %v3007_v36  ;;  %v1269_v18 = vadd.f32 %v1181_v15, %v1165_v3  ;;  %v1183_v47 = vsub.f32 %v1087_v43, %v3008_v31  ;;  %v3010_v23 = vld [vmem:[#allocation15_spill] sm:$0xff]  ;;  %v3011_v3 = vld [vmem:[#allocation16_spill] sm:$0xff] }
 0x1fb   : > { %v1083_v1 = vadd.f32 %v1075_v60, %v1067_v61  ;;  %v1020_v24 = vadd.f32 %v2697_v28, %v1004_v40  ;;  %v795_v37 = vadd.f32 %v2731_v50, %v3009_v29  ;;  %v794_v14 = vadd.f32 %v2733_v35, %v3010_v23  ;;  %v3012_v40 = vld [vmem:[#allocation17_spill] sm:$0xff] }
 0x1fc   : > { %v1089_v27 = vmul.f32 0.11111111, %v1081_v4  ;;  %v1019_v59 = vadd.f32 %v2711_v8, %v1003_v30  ;;  %v1270_v38 = vadd.f32 %v1182_v34, %v1166_v53  ;;  %v1184_v52 = vsub.f32 %v1088_v51, %v2654_v48 }
 0x1fd   : > { %v1090_v15 = vmul.f32 0.11111111, %v1082_v9  ;;  %v1025_v13 = vmul.f32 0.11111111, %v1017_v20  ;;  %v1092_v25 = vmul.f32 0.11111111, %v1084_v57  ;;  %v1271_v46 = vadd.f32 %v1183_v47, %v1167_v55 }
 0x1fe   : > { %v805_v17 = vpop.permute.xlu1 %804  ;;  %v803_v19 = vpop.permute.xlu0 %802  ;;  %v1026_v28 = vmul.f32 0.11111111, %v1018_v62  ;;  %v1277_v0 = vadd.f32 0.0009, %v1269_v18  ;;  %v1091_v50 = vmul.f32 0.11111111, %v1083_v1  ;;  %v797_v35 = vadd.f32 %v2761_v10, %v3011_v3 }
 0x1ff   : > { %v827_v43 = vadd.f32 %v805_v17, %v795_v37  ;;  %v826_v54 = vadd.f32 %v803_v19, %v794_v14  ;;  %v1028_v11 = vmul.f32 0.11111111, %v1020_v24  ;;  %v796_v8 = vadd.f32 %v2763_v44, %v3012_v40  ;;  %v3013_v62 = vld [vmem:[#allocation30_spill] sm:$0xff]  ;;  %v3014_v57 = vld [vmem:[#allocation23_spill] sm:$0xff]  ;;  %v3017_v17 = vld [vmem:[#allocation20_spill] sm:$0xff] }
 0x200   : > { %v1185_v48 = vsub.f32 %v1089_v27, %v2670_v7  ;;  %v1027_v53 = vmul.f32 0.11111111, %v1019_v59  ;;  %v1278_v6 = vadd.f32 0.0009, %v1270_v38  ;;  %v1272_v61 = vadd.f32 %v1184_v52, %v1168_v41  ;;  %v3015_v55 = vld [vmem:[#allocation18_spill] sm:$0xff]  ;;  %v3016_v18 = vld [vmem:[#allocation19_spill] sm:$0xff] }
 0x201   : > { %1094 = vst.msk [vmem:[#allocation4 + $0x9] sm:$0xff] %vm834_vm3, %v827_v43  ;;  %1093 = vst.msk [vmem:[#allocation4 + $0x1] sm:$0xff] %vm834_vm3, %v826_v54  ;;  %v1186_v10 = vsub.f32 %v1090_v15, %v2694_v45  ;;  %v1169_v34 = vsub.f32 %v1025_v13, %v2552_v39  ;;  %v1188_v9 = vsub.f32 %v1092_v25, %v2765_v49  ;;  %v1279_v60 = vadd.f32 0.0009, %v1271_v46  ;;  %v3018_v38 = vld [vmem:[#allocation21_spill] sm:$0xff] }
 0x202   : > { %1105 = vst.msk [vmem:[#allocation4 + $0xb] sm:$0x40] %vm848_vm4, %v827_v43  ;;  %v809_v4 = vpop.permute.xlu1 %808  ;;  %v807_v30 = vpop.permute.xlu0 %806  ;;  %v1170_v56 = vsub.f32 %v1026_v28, %v2548_v2  ;;  %v1285_v20 = vmul.f32 %v1277_v0, %v3013_v62  ;;  %v1187_v7 = vsub.f32 %v1091_v50, %v2757_v33  ;;  %v1172_v36 = vsub.f32 %v1028_v11, %v3014_v57  ;;  %v3019_v11 = vld [vmem:[#allocation24_spill] sm:$0xff] }
 0x203   : > { %1101 = vst.msk [vmem:[#allocation4 - $0x1] sm:$0x2] %vm843_vm5, %v826_v54  ;;  %v829_v44 = vadd.f32 %v809_v4, %v797_v35  ;;  %v828_v51 = vadd.f32 %v807_v30, %v796_v8  ;;  %v799_v41 = vadd.f32 %v2785_v12, %v3015_v55  ;;  %v798_v45 = vadd.f32 %v2787_v22, %v3016_v18 }
 0x204   : > { %v1273_v2 = vadd.f32 %v1185_v48, %v1169_v34  ;;  %v1171_v39 = vsub.f32 %v1027_v53, %v2592_v63  ;;  %v1286_v33 = vmul.f32 %v1278_v6, %v2727_v58  ;;  %v1280_v31 = vadd.f32 0.0009, %v1272_v61  ;;  %v3020_v6 = vld [vmem:[#allocation39_spill] sm:$0xff] }
 0x205   : > { %1096 = vst.msk [vmem:[#allocation4 + $0x21] sm:$0xff] %vm834_vm3, %v829_v44  ;;  %1095 = vst.msk [vmem:[#allocation4 + $0x19] sm:$0xff] %vm834_vm3, %v828_v51  ;;  %v1274_v1 = vadd.f32 %v1186_v10, %v1170_v56  ;;  %v1260_v22 = vadd.f32 %v2765_v49, %v3014_v57  ;;  %v1276_v37 = vadd.f32 %v1188_v9, %v1172_v36  ;;  %v1267_v23 = vadd.f32 0.0001, %v2783_v42  ;;  %v3021_v10 = vld [vmem:[#allocation41_spill] sm:$0xff]  ;;  %v3022_v56 = vld [vmem:[#allocation42_spill] sm:$0xff] }
 0x206   : > { %1106 = vst.msk [vmem:[#allocation4 + $0x23] sm:$0x40] %vm848_vm4, %v829_v44  ;;  %v813_v47 = vpop.permute.xlu1 %812  ;;  %v811_v12 = vpop.permute.xlu0 %810  ;;  %1546 = vrcp.f32 %v1285_v20  ;;  %v1287_v59 = vmul.f32 %v1279_v60, %v2703_v32  ;;  %v1275_v63 = vadd.f32 %v1187_v7, %v1171_v39  ;;  %v801_v58 = vadd.f32 %v2800_v5, %v3017_v17  ;;  %v3023_v57 = vld [vmem:[#allocation26_spill] sm:$0xff]  ;;  %v3024_v39 = vld [vmem:[#allocation25_spill] sm:$0xff] }
 0x207   : > { %1102 = vst.msk [vmem:[#allocation4 + $0x17] sm:$0x2] %vm843_vm5, %v828_v51  ;;  %v831_v24 = vadd.f32 %v813_v47, %v799_v41  ;;  %v830_v29 = vadd.f32 %v811_v12, %v798_v45  ;;  %v800_v19 = vadd.f32 %v2802_v16, %v3018_v38  ;;  %v1281_v49 = vadd.f32 0.0009, %v1273_v2 }
 0x208   : > { %v1117_v27 = vld [vmem:[#allocation4 + $0x1] sm:$0xff]  ;;  %v1118_v15 = vld [vmem:[#allocation4 + $0x9] sm:$0xff]  ;;  %1548 = vrcp.f32 %v1286_v33  ;;  %v1288_v32 = vmul.f32 %v1280_v31, %v2759_v21  ;;  %v1282_v13 = vadd.f32 0.0009, %v1274_v1  ;;  %v1284_v0 = vadd.f32 0.0009, %v1276_v37 }
 0x209   : > { %1098 = vst.msk [vmem:[#allocation4 + $0x39] sm:$0xff] %vm834_vm3, %v831_v24  ;;  %1097 = vst.msk [vmem:[#allocation4 + $0x31] sm:$0xff] %vm834_vm3, %v830_v29  ;;  %v1110_v42 = vld [vmem:[#allocation4 + $0x8] sm:$0xff]  ;;  %v1219_v3 = vmul.f32 %v3019_v11, %v2725_v26  ;;  %v1268_v35 = vadd.f32 0.0001, %v1260_v22  ;;  %1550 = vrcp.f32 %v1287_v59  ;;  %v1289_v4 = vmul.f32 %v1281_v49, %v3020_v6  ;;  %v3028_v11 = vld [vmem:[#allocation28_spill] sm:$0xff] }
 0x20a   : > { %v1109_v14 = vld [vmem:[#allocation4] sm:$0xff]  ;;  %1107 = vst.msk [vmem:[#allocation4 + $0x3b] sm:$0x40] %vm848_vm4, %v831_v24  ;;  %v817_v5 = vpop.permute.xlu1 %816  ;;  %v815_v43 = vpop.permute.xlu0 %814  ;;  %v1126_v54 = vadd.f32 %v1118_v15, %v1110_v42  ;;  %v1134_v25 = vld [vmem:[#allocation4 + $0xa] sm:$0xff]  ;;  %v1283_v48 = vadd.f32 0.0009, %v1275_v63  ;;  %1552 = vrcp.f32 %v1288_v32  ;;  %v1290_v34 = vmul.f32 %v1282_v13, %v3021_v10 }
 0x20b   : > { %v1125_v52 = vadd.f32 %v1117_v27, %v1109_v14  ;;  %1103 = vst.msk [vmem:[#allocation4 + $0x2f] sm:$0x2] %vm843_vm5, %v830_v29  ;;  %v1133_v16 = vld [vmem:[#allocation4 + $0x2] sm:$0xff]  ;;  %v833_v28 = vadd.f32 %v817_v5, %v801_v58  ;;  %v832_v46 = vadd.f32 %v815_v43, %v800_v19  ;;  %v2865_v62 = vadd.f32 0.0001, %v3022_v56 }
 0x20c   : > { %v1119_v8 = vld [vmem:[#allocation4 + $0x19] sm:$0xff]  ;;  %v1142_v53 = vadd.f32 %v1134_v25, %v1126_v54  ;;  %v1120_v30 = vld [vmem:[#allocation4 + $0x21] sm:$0xff]  ;;  %v1292_v60 = vmul.f32 %v1284_v0, %v1268_v35  ;;  %v2868_v55 = vadd.f32 0.0001, %v1219_v3  ;;  %v1291_v45 = vmul.f32 %v1283_v48, %v1267_v23 }
 0x20d   : > { %v1141_v50 = vadd.f32 %v1133_v16, %v1125_v52  ;;  %1100 = vst.msk [vmem:[#allocation4 + $0x51] sm:$0xff] %vm834_vm3, %v833_v28  ;;  %1099 = vst.msk [vmem:[#allocation4 + $0x49] sm:$0xff] %vm834_vm3, %v832_v46  ;;  %v1112_v61 = vld [vmem:[#allocation4 + $0x20] sm:$0xff]  ;;  %1554 = vrcp.f32 %v1289_v4  ;;  %v3026_v52 = vld [vmem:[#allocation31_spill] sm:$0xff] }
 0x20e   : > { %v1111_v40 = vld [vmem:[#allocation4 + $0x18] sm:$0xff]  ;;  %1108 = vst.msk [vmem:[#allocation4 + $0x53] sm:$0x40] %vm848_vm4, %v833_v28  ;;  %v1128_v44 = vadd.f32 %v1120_v30, %v1112_v61  ;;  %v1150_v9 = vmul.f32 0.11111111, %v1142_v53  ;;  %v1136_v20 = vld [vmem:[#allocation4 + $0x22] sm:$0xff]  ;;  %1556 = vrcp.f32 %v1290_v34 }
 0x20f   : > { %v1127_v21 = vadd.f32 %v1119_v8, %v1111_v40  ;;  %1104 = vst.msk [vmem:[#allocation4 + $0x47] sm:$0x2] %vm843_vm5, %v832_v46  ;;  %v1149_v26 = vmul.f32 0.11111111, %v1141_v50  ;;  %v1135_v51 = vld [vmem:[#allocation4 + $0x1a] sm:$0xff]  ;;  %1558 = vrcp.f32 %v1292_v60  ;;  %v3030_v61 = vld [vmem:[#allocation36_spill] sm:$0xff] }
 0x210   : > { %v1121_v18 = vld [vmem:[#allocation4 + $0x31] sm:$0xff]  ;;  %v1144_v2 = vadd.f32 %v1136_v20, %v1128_v44  ;;  %v1198_v33 = vsub.f32 %v1150_v9, %v3024_v39  ;;  %v1122_v1 = vld [vmem:[#allocation4 + $0x39] sm:$0xff]  ;;  %1560 = vrcp.f32 %v1291_v45  ;;  %v3033_v45 = vld [vmem:[#allocation43_spill] sm:$0xff] }
 0x211   : > { %v1143_v7 = vadd.f32 %v1135_v51, %v1127_v21  ;;  %v1197_v36 = vsub.f32 %v1149_v26, %v3023_v57  ;;  %v1114_v47 = vld [vmem:[#allocation4 + $0x38] sm:$0xff]  ;;  %v3025_v63 = vld [vmem:[#allocation34_spill] sm:$0xff]  ;;  %v3032_v57 = vld [vmem:[#allocation32_spill] sm:$0xff] }
 0x212   : > { %v1113_v41 = vld [vmem:[#allocation4 + $0x30] sm:$0xff]  ;;  %v1130_v24 = vadd.f32 %v1122_v1, %v1114_v47  ;;  %v1152_v37 = vmul.f32 0.11111111, %v1144_v2  ;;  %v1230_v14 = vmul.f32 2.0, %v1198_v33  ;;  %v1138_v27 = vld [vmem:[#allocation4 + $0x3a] sm:$0xff] }
 0x213   : > { %v1129_v31 = vadd.f32 %v1121_v18, %v1113_v41  ;;  %v1151_v12 = vmul.f32 0.11111111, %v1143_v7  ;;  %v1229_v22 = vmul.f32 2.0, %v1197_v36  ;;  %v1137_v29 = vld [vmem:[#allocation4 + $0x32] sm:$0xff]  ;;  %v1547_v15 = vpop.eup %1546 }
 0x214   : > { %v1123_v38 = vld [vmem:[#allocation4 + $0x49] sm:$0xff]  ;;  %v1146_v19 = vadd.f32 %v1138_v27, %v1130_v24  ;;  %v1200_v49 = vsub.f32 %v1152_v37, %v3026_v52  ;;  %v1238_v42 = vadd.f32 0.0009, %v1230_v14  ;;  %v1124_v5 = vld [vmem:[#allocation4 + $0x51] sm:$0xff]  ;;  %v3035_v37 = vld [vmem:[#allocation38_spill] sm:$0xff] }
 0x215   : > { %v1145_v59 = vadd.f32 %v1137_v29, %v1129_v31  ;;  %v1199_v17 = vsub.f32 %v1151_v12, %v3025_v63  ;;  %v1237_v23 = vadd.f32 0.0009, %v1229_v22  ;;  %v1116_v13 = vld [vmem:[#allocation4 + $0x50] sm:$0xff]  ;;  %v3027_v16 = vld [vmem:[#allocation29_spill] sm:$0xff]  ;;  %v1549_v35 = vpop.eup %1548 }
 0x216   : > { %v1115_v58 = vld [vmem:[#allocation4 + $0x48] sm:$0xff]  ;;  %v1132_v28 = vadd.f32 %v1124_v5, %v1116_v13  ;;  %v1154_v46 = vmul.f32 0.11111111, %v1146_v19  ;;  %v1232_v50 = vmul.f32 2.0, %v1200_v49  ;;  %v1246_v3 = vmul.f32 %v1238_v42, %v3028_v11  ;;  %v1140_v40 = vld [vmem:[#allocation4 + $0x52] sm:$0xff]  ;;  %v1551_v20 = vpop.eup %1550 }
 0x217   : > { %v1131_v32 = vadd.f32 %v1123_v38, %v1115_v58  ;;  %v1153_v43 = vmul.f32 0.11111111, %v1145_v59  ;;  %v1231_v54 = vmul.f32 2.0, %v1199_v17  ;;  %v1245_v25 = vmul.f32 %v1237_v23, %v3027_v16  ;;  %v1139_v0 = vld [vmem:[#allocation4 + $0x4a] sm:$0xff]  ;;  %v3029_v48 = vld [vmem:[#allocation37_spill] sm:$0xff]  ;;  %v1553_v18 = vpop.eup %1552 }
 0x218   : > { %v1148_v4 = vadd.f32 %v1140_v40, %v1132_v28  ;;  %v1202_v30 = vsub.f32 %v1154_v46, %v3030_v61  ;;  %v1240_v26 = vadd.f32 0.0009, %v1232_v50  ;;  %v1302_v10 = vmul.f32 %v1549_v35, %v1246_v3  ;;  %v3031_v51 = vld [vmem:[#allocation33_spill] sm:$0xff]  ;;  %v3034_v47 = vld [vmem:[#allocation40_spill] sm:$0xff]  ;;  %v3036_v23 = vld [vmem:[#allocation35_spill] sm:$0xff] }
 0x219   : > { %v1147_v8 = vadd.f32 %v1139_v0, %v1131_v32  ;;  %v1201_v53 = vsub.f32 %v1153_v43, %v3029_v48  ;;  %v1239_v21 = vadd.f32 0.0009, %v1231_v54  ;;  %v1301_v6 = vmul.f32 %v1547_v15, %v1245_v25 }
 0x21a   : > { %v1156_v60 = vmul.f32 0.11111111, %v1148_v4  ;;  %v1234_v7 = vmul.f32 2.0, %v1202_v30  ;;  %v1248_v36 = vmul.f32 %v1240_v26, %v3032_v57  ;;  %v1310_v41 = vsub.f32 1.0, %v1302_v10  ;;  %v1555_v63 = vpop.eup %1554 }
 0x21b   : > { %v1155_v34 = vmul.f32 0.11111111, %v1147_v8  ;;  %v1233_v44 = vmul.f32 2.0, %v1201_v53  ;;  %v1247_v9 = vmul.f32 %v1239_v21, %v3031_v51  ;;  %v1309_v56 = vsub.f32 1.0, %v1301_v6  ;;  %v1557_v52 = vpop.eup %1556 }
 0x21c   : > { %v1204_v1 = vsub.f32 %v1156_v60, %v3034_v47  ;;  %v1242_v12 = vadd.f32 0.0009, %v1234_v7  ;;  %v1304_v22 = vmul.f32 %v1553_v18, %v1248_v36  ;;  %v1318_v24 = vmul.f32 0.5, %v1310_v41  ;;  %v1559_v13 = vpop.eup %1558 }
 0x21d   : > { %v1203_v2 = vsub.f32 %v1155_v34, %v3033_v45  ;;  %v1241_v39 = vadd.f32 0.0009, %v1233_v44  ;;  %v1303_v33 = vmul.f32 %v1551_v20, %v1247_v9  ;;  %v1317_v31 = vmul.f32 0.5, %v1309_v56  ;;  %v1561_v25 = vpop.eup %1560 }
 0x21e   : > { %v1236_v17 = vmul.f32 2.0, %v1204_v1  ;;  %v1250_v58 = vmul.f32 %v1242_v12, %v3036_v23  ;;  %v1312_v38 = vsub.f32 1.0, %v1304_v22  ;;  %v1326_v19 = vmax.f32 %v1318_v24, 0.0 }
 0x21f   : > { %v1235_v29 = vmul.f32 2.0, %v1203_v2  ;;  %v1249_v14 = vmul.f32 %v1241_v39, %v3035_v37  ;;  %v1311_v27 = vsub.f32 1.0, %v1303_v33  ;;  %v1325_v59 = vmax.f32 %v1317_v31, 0.0 }
 0x220   : > { %v1244_v5 = vadd.f32 0.0009, %v1236_v17  ;;  %v1306_v43 = vmul.f32 %v1557_v52, %v1250_v58  ;;  %v1320_v54 = vmul.f32 0.5, %v1312_v38  ;;  %v1334_v16 = vmin.f32 %v1326_v19, 1.0 }
 0x221   : > { %v1243_v49 = vadd.f32 0.0009, %v1235_v29  ;;  %v1305_v42 = vmul.f32 %v1555_v63, %v1249_v14  ;;  %v1319_v15 = vmul.f32 0.5, %v1311_v27  ;;  %v1333_v32 = vmin.f32 %v1325_v59, 1.0 }
 0x222   : > { %v1252_v50 = vmul.f32 %v1244_v5, %v2865_v62  ;;  %v1314_v11 = vsub.f32 1.0, %v1306_v43  ;;  %v1328_v3 = vmax.f32 %v1320_v54, 0.0  ;;  %1342 = vst.msk [vmem:[%s2885_s28 + $0x8] sm:$0xff] %vm834_vm3, %v1334_v16 }
 0x223   : > { %v1251_v28 = vmul.f32 %v1243_v49, %v2868_v55  ;;  %v1313_v0 = vsub.f32 1.0, %v1305_v42  ;;  %v1327_v46 = vmax.f32 %v1319_v15, 0.0  ;;  %1341 = vst.msk [vmem:[%s2885_s28] sm:$0xff] %vm834_vm3, %v1333_v32 }
 0x224   : > { %v1308_v8 = vmul.f32 %v1559_v13, %v1252_v50  ;;  %v1322_v48 = vmul.f32 0.5, %v1314_v11  ;;  %v1336_v53 = vmin.f32 %v1328_v3, 1.0 }
 0x225   : > { %v1307_v35 = vmul.f32 %v1561_v25, %v1251_v28  ;;  %v1321_v40 = vmul.f32 0.5, %v1313_v0  ;;  %v1335_v55 = vmin.f32 %v1327_v46, 1.0 }
 0x226   : > { %v1316_v4 = vsub.f32 1.0, %v1308_v8  ;;  %v1330_v62 = vmax.f32 %v1322_v48, 0.0  ;;  %1344 = vst.msk [vmem:[%s2885_s28 + $0x18] sm:$0xff] %vm834_vm3, %v1336_v53 }
 0x227   : > { %v1315_v21 = vsub.f32 1.0, %v1307_v35  ;;  %v1329_v6 = vmax.f32 %v1321_v40, 0.0  ;;  %1343 = vst.msk [vmem:[%s2885_s28 + $0x10] sm:$0xff] %vm834_vm3, %v1335_v55 }
 0x228   : > { %v1324_v26 = vmul.f32 0.5, %v1316_v4  ;;  %v1338_v10 = vmin.f32 %v1330_v62, 1.0 }
 0x229   : > { %v1323_v61 = vmul.f32 0.5, %v1315_v21  ;;  %v1337_v30 = vmin.f32 %v1329_v6, 1.0 }
 0x22a   : > { %v1332_v44 = vmax.f32 %v1324_v26, 0.0  ;;  %1346 = vst.msk [vmem:[%s2885_s28 + $0x28] sm:$0xff] %vm834_vm3, %v1338_v10 }
 0x22b   : > { %v1331_v34 = vmax.f32 %v1323_v61, 0.0  ;;  %1345 = vst.msk [vmem:[%s2885_s28 + $0x20] sm:$0xff] %vm834_vm3, %v1337_v30 }
 0x22c   : > { %v1340_v9 = vmin.f32 %v1332_v44, 1.0 }
 0x22d   : > { %v1339_v51 = vmin.f32 %v1331_v34, 1.0 }
 0x22e   : > { %1348 = vst.msk [vmem:[%s2885_s28 + $0x38] sm:$0xff] %vm834_vm3, %v1340_v9 }
 0x22f   : > { %1347 = vst.msk [vmem:[%s2885_s28 + $0x30] sm:$0xff] %vm834_vm3, %v1339_v51 }
 0x230   : > { %1631 = shalt.err (!%p1628_p4)
}
 0x231   : > { %s1632_s4 = scalar_lea.hbm %s2905_s23, 1024  ;;  %s1636_s5 = scalar_lea.hbm %s2956_s2, 2048 }
 0x232   : > { %p1633_p9 = scmp.ne.s32.totalorder %s2905_s23, %s1632_s4  ;;  %p1637_p5 = scmp.lt.s32.totalorder %s2905_s23, %s2956_s2 }
 0x233   : > { %p1638_p8 = scmp.lt.s32.totalorder %s1636_s5, %s1632_s4 }
 0x234   : > { %p1634_p11 = pnand %p1633_p9, %p3037_p1 }
 0x235   : > { %p1639_p6 = por %p1638_p8, %p1637_p5 }
 0x236   : > { %p1635_p3 = pneg %p1634_p11 }
 0x238   : > { %p1640_p13 = pnand %p1639_p6, %p1635_p3 }
 0x23a   : > { %1643 = shalt.err (!%p1640_p13)
}
 0x23b   : > { %s1697_s14 = smov 128   ;;  %s1698_s17 = smov 8  }
 0x23c   : > { %1491 = dma.vmem_to_hbm [thread:$0]  (%p3037_p1), %s2907_s24, 1024, %s2905_s23, %s1350_s13, %s1697_s14, %s1697_s14, %s1698_s17  }
 0x23d PF: > { %s1379_s28 = sand.u32 1, %s1674_s9   ;;  %p3038_p12 = scmp.ne.s32.totalorder %s2973_s22, 0 }
 0x23e   : > { %p3039_p7 = scmp.ge.s32.totalorder %s1686_s12, 2  ;;  %s1380_s19 = scalar_lea.sflag [#allocation7], %s1379_s28 }
 0x240   : > { %p1501_p10 = pnand %p3039_p7, %p3038_p12 }
 0x242   : > { %p1502_p0 = pneg %p1501_p10 }
 0x244   : > { %1669 = dma.done.wait (%p1502_p0), %s1380_s19, 1024  }
 0x245   : > { %1671 = vsyncadd (%p1502_p0), %s1380_s19, 4294966272  ;;  %p18_p2 = scmp.ge.s32.totalorder %s1739_s15, 4   ;;  %s3040_s9 = smov %s1678_s10 }
 0x246   : > { %s3041_s10 = smov %s1682_s11  ;;  %s3042_s11 = smov %s1751_s18 }
 0x247   : > { %s3043_s12 = smov %s1739_s15  ;;  %20 = sbr.rel (!%p18_p2) target bundleno = 7 (0x7), region = 86 }
 0x24c   :  { %1385 = vsyncpa [#allocation6], 1 }
 0x24d   :  { %1387 = vsyncpa [#allocation6 + $0x1], 1 }
 0x24e   :  { %1388 = vsyncpa [#allocation9], 1 }
 0x24f   :  { %1390 = vsyncpa [#allocation9 + $0x1], 1 }
 0x250   :  { %1391 = vsyncpa [#allocation7], 1 }
 0x251   :  { %1393 = vsyncpa [#allocation7 + $0x1], 1 }

</bundles_post_ra>
